<compile_context>
chip_gen: v6e
topology: v6e:2x2x1
jax: 0.10.0
libtpu: 0.0.40
codegen_flags: <defaults>
</compile_context>

<pallas_src>
import jax
import jax.numpy as jnp
import numpy as np
from jax.experimental import pallas as pl
from jax.experimental.pallas import tpu as pltpu

D_IN, D1, D2, D3, D4 = 84, 40, 60, 15, 10   # fc1, fc2/bilinear, fc3, fc4 sizes


def nnet_kernel(x_ref, que_ref, w1_ref, w2_ref, w2d_ref, e_ref, r_ref,
                w3_ref, w4_ref, bias_ref, out_ref):
    f32, bf16 = jnp.float32, jnp.bfloat16

    x = x_ref[...]                        # [TB, 84]  f32
    que = que_ref[...]                    # [TB, 60]  f32

    # One bias per row of the [8,128] pack -> sublane-aligned, lane-0 slices.
    b1 = bias_ref[0:1, :D1]
    b2 = bias_ref[1:2, :D2]
    bb = bias_ref[2:3, :D2]
    b3 = bias_ref[3:4, :D3]
    b4 = bias_ref[4:5, :D4]

    # fc1 -> tanh, fc2 -> tanh (tiny f32 matmuls; tanh goes to the EUP).
    h1 = jnp.tanh(jnp.dot(x, w1_ref[...], preferred_element_type=f32) + b1)
    h2 = jnp.tanh(jnp.dot(h1, w2_ref[...], preferred_element_type=f32) + b2)

    # Bilinear, entirely on the MXU (bf16 inputs, f32 accumulation):
    #   m[b, j*60+o]  = sum_i h2[b,i] * W[o,i,j]
    #   qb[b, j*60+o] = que[b, j]                    (0/1 expansion matrix E)
    #   ybil[b, o]    = sum_j m*qb  + bbil           (0/1 reduction matrix R)
    m = jnp.dot(h2.astype(bf16), w2d_ref[...], preferred_element_type=f32)
    qb = jnp.dot(que.astype(bf16), e_ref[...], preferred_element_type=f32)
    prod = m * qb                          # single aligned [TB,3600] f32 multiply
    ybil = jnp.dot(prod.astype(bf16), r_ref[...],
                   preferred_element_type=f32) + bb

    # fc3 -> tanh, fc4 -> tanh
    h3 = jnp.tanh(jnp.dot(ybil, w3_ref[...], preferred_element_type=f32) + b3)
    out_ref[...] = jnp.tanh(
        jnp.dot(h3, w4_ref[...], preferred_element_type=f32) + b4)


def prepare_params(params):
    """One-time parameter packing; do NOT call per forward pass."""
    w1, b1, w2, b2, wbil, bbil, w3, b3, w4, b4 = params
    f32, bf16 = jnp.float32, jnp.bfloat16

    # W2D[i, j*60+o] = W[o, i, j]  (bf16: native MXU mode, halves the DMA).
    w2d = jnp.transpose(wbil, (1, 2, 0)).reshape(D2, D2 * D2).astype(bf16)

    # 0/1 expansion / reduction matrices (exact in bf16).
    cols = np.arange(D2 * D2)
    j_of_col = cols // D2
    o_of_col = cols % D2
    e_mat = jnp.asarray(
        (np.arange(D2)[:, None] == j_of_col[None, :]).astype(np.float32)
    ).astype(bf16)                                       # [60, 3600]
    r_mat = jnp.asarray(
        (o_of_col[:, None] == np.arange(D2)[None, :]).astype(np.float32)
    ).astype(bf16)                                       # [3600, 60]

    # Biases: one per row of an [8,128] f32 block (rows 5..7 are padding).
    def row(b):
        b = jnp.reshape(b, (1, -1)).astype(f32)
        return jnp.pad(b, ((0, 0), (0, 128 - b.shape[1])))

    biases = jnp.concatenate(
        [row(b1), row(b2), row(bbil), row(b3), row(b4),
         jnp.zeros((3, 128), f32)], axis=0)              # [8, 128]

    return (w1.astype(f32), w2.astype(f32), w2d, e_mat, r_mat,
            w3.astype(f32), w4.astype(f32), biases)


def _round_up(n, m):
    return ((n + m - 1) // m) * m


def nnet_forward(x, que_rep, packed, *, block_b=128):
    """x: [B, 84], que_rep: [B, 60]  ->  [B, 10].

    block_b: max batch tile.  128 is safe on every generation with the default
    scoped-VMEM limit (per-tile [TB,3600] f32 temporaries ~= TB*43 KB plus
    ~3 MB of resident constants).  On v6e/v7x, TB up to ~256 is fine; beyond
    that pass vmem_limit_bytes via CompilerParams.  The tile is also capped at
    ceil(B/2) (rounded to 8) so large batches always give >=2 grid steps and
    the "parallel" axis can shard across v7x's two TensorCores.
    """
    w1, w2, w2d, e_mat, r_mat, w3, w4, biases = packed
    B = x.shape[0]

    half = (B + 1) // 2
    tb = max(8, min(block_b, _round_up(half, 8)))
    b_pad = _round_up(B, tb)
    if b_pad != B:
        x = jnp.pad(x, ((0, b_pad - B), (0, 0)))
        que_rep = jnp.pad(que_rep, ((0, b_pad - B), (0, 0)))

    def act(feat):                         # batch-tiled activations
        return pl.BlockSpec((tb, feat), lambda b: (b, 0))

    def resident(arr):                     # weights: constant index_map -> VMEM-resident
        return pl.BlockSpec(arr.shape, lambda b: (0, 0))

    out = pl.pallas_call(
        nnet_kernel,
        out_shape=jax.ShapeDtypeStruct((b_pad, D4), jnp.float32),
        grid=(b_pad // tb,),
        in_specs=[act(D_IN), act(D2),
                  resident(w1), resident(w2), resident(w2d),
                  resident(e_mat), resident(r_mat),
                  resident(w3), resident(w4), resident(biases)],
        out_specs=act(D4),
        compiler_params=pltpu.CompilerParams(
            dimension_semantics=("parallel",)),   # megacore / v7x 2-TC sharding
    )(x, que_rep, w1, w2, w2d, e_mat, r_mat, w3, w4, biases)
    return out[:B]


def init_params(key):
    """Deterministic init mimicking PyTorch's U(-1/sqrt(fan_in), 1/sqrt(fan_in))."""
    ks = jax.random.split(key, 10)

    def u(k, shape, fan_in):
        bound = 1.0 / np.sqrt(fan_in)
        return jax.random.uniform(k, shape, jnp.float32, -bound, bound)

    w1 = u(ks[0], (D_IN, D1), D_IN)
    b1 = u(ks[1], (1, D1), D_IN)
    w2 = u(ks[2], (D1, D2), D1)
    b2 = u(ks[3], (1, D2), D1)
    wbil = u(ks[4], (D2, D2, D2), D2)      # [out, in1, in2] like nn.Bilinear
    bbil = u(ks[5], (1, D2), D2)
    w3 = u(ks[6], (D2, D3), D2)
    b3 = u(ks[7], (1, D3), D2)
    w4 = u(ks[8], (D3, D4), D3)
    b4 = u(ks[9], (1, D4), D3)
    return (w1, b1, w2, b2, wbil, bbil, w3, b3, w4, b4)


def ref_forward(x, que, params):
    w1, b1, w2, b2, wbil, bbil, w3, b3, w4, b4 = params
    h1 = jnp.tanh(x @ w1 + b1)
    h2 = jnp.tanh(h1 @ w2 + b2)
    y = jnp.einsum('bi,oij,bj->bo', h2, wbil, que) + bbil
    h3 = jnp.tanh(y @ w3 + b3)
    return jnp.tanh(h3 @ w4 + b4)


if __name__ == "__main__":
    key = jax.random.PRNGKey(0)
    k_params, k_x, k_q = jax.random.split(key, 3)

    B = 8
    params = init_params(k_params)
    packed = prepare_params(params)       # one-time packing, outside the call path

    x = jax.random.normal(k_x, (B, D_IN), jnp.float32)
    # que_rep is a module-level global in the original module; explicit input here.
    que_rep = jax.random.normal(k_q, (B, D2), jnp.float32)

    out = nnet_forward(x, que_rep, packed)
    out = jax.block_until_ready(out)

    ref = ref_forward(x, que_rep, params)
    assert out.shape == (B, D4)
    # bf16 bilinear path (h2, W2D, que, prod) -> tolerance loosened vs f32 ref.
    assert np.allclose(np.asarray(out), np.asarray(ref), atol=3e-2, rtol=3e-2)

    print("KERNEL_OK")
</pallas_src>

<mosaic_0001>
module attributes {stable_mosaic.version = 11 : i64} {
  func.func @nnet_kernel(%arg0: i32, %arg1: memref<8x84xf32, #tpu.memory_space<vmem>>, %arg2: memref<8x60xf32, #tpu.memory_space<vmem>>, %arg3: memref<84x40xf32, #tpu.memory_space<vmem>>, %arg4: memref<40x60xf32, #tpu.memory_space<vmem>>, %arg5: memref<60x3600xbf16, #tpu.memory_space<vmem>>, %arg6: memref<60x3600xbf16, #tpu.memory_space<vmem>>, %arg7: memref<3600x60xbf16, #tpu.memory_space<vmem>>, %arg8: memref<60x15xf32, #tpu.memory_space<vmem>>, %arg9: memref<15x10xf32, #tpu.memory_space<vmem>>, %arg10: memref<8x128xf32, #tpu.memory_space<vmem>>, %arg11: memref<8x10xf32, #tpu.memory_space<vmem>>) attributes {dimension_semantics = [#tpu.dimension_semantics<parallel>], iteration_bounds = array<i64: 1>, scalar_prefetch = 0 : i64, scratch_operands = 0 : i64, tpu.core_type = #tpu.core_type<tc>, window_params = [{transform_indices = @transform_0, window_bounds = array<i64: 8, 84>}, {transform_indices = @transform_1, window_bounds = array<i64: 8, 60>}, {pipeline_mode = #tpu.pipeline_mode<synchronous>, transform_indices = @transform_2, window_bounds = array<i64: 84, 40>}, {pipeline_mode = #tpu.pipeline_mode<synchronous>, transform_indices = @transform_3, window_bounds = array<i64: 40, 60>}, {pipeline_mode = #tpu.pipeline_mode<synchronous>, transform_indices = @transform_4, window_bounds = array<i64: 60, 3600>}, {pipeline_mode = #tpu.pipeline_mode<synchronous>, transform_indices = @transform_5, window_bounds = array<i64: 60, 3600>}, {pipeline_mode = #tpu.pipeline_mode<synchronous>, transform_indices = @transform_6, window_bounds = array<i64: 3600, 60>}, {pipeline_mode = #tpu.pipeline_mode<synchronous>, transform_indices = @transform_7, window_bounds = array<i64: 60, 15>}, {pipeline_mode = #tpu.pipeline_mode<synchronous>, transform_indices = @transform_8, window_bounds = array<i64: 15, 10>}, {pipeline_mode = #tpu.pipeline_mode<synchronous>, transform_indices = @transform_9, window_bounds = array<i64: 8, 128>}, {transform_indices = @transform_10, window_bounds = array<i64: 8, 10>}]} {
    %c0 = arith.constant 0 : index
    %c0_0 = arith.constant 0 : index
    %0 = vector.load %arg1[%c0, %c0_0] : memref<8x84xf32, #tpu.memory_space<vmem>>, vector<8x84xf32>
    %c0_1 = arith.constant 0 : index
    %c0_2 = arith.constant 0 : index
    %1 = vector.load %arg2[%c0_1, %c0_2] : memref<8x60xf32, #tpu.memory_space<vmem>>, vector<8x60xf32>
    %c0_3 = arith.constant 0 : index
    %c0_4 = arith.constant 0 : index
    %2 = vector.load %arg10[%c0_3, %c0_4] : memref<8x128xf32, #tpu.memory_space<vmem>>, vector<1x40xf32>
    %c1 = arith.constant 1 : index
    %c0_5 = arith.constant 0 : index
    %3 = vector.load %arg10[%c1, %c0_5] : memref<8x128xf32, #tpu.memory_space<vmem>>, vector<1x60xf32>
    %c2 = arith.constant 2 : index
    %c0_6 = arith.constant 0 : index
    %4 = vector.load %arg10[%c2, %c0_6] : memref<8x128xf32, #tpu.memory_space<vmem>>, vector<1x60xf32>
    %c3 = arith.constant 3 : index
    %c0_7 = arith.constant 0 : index
    %5 = vector.load %arg10[%c3, %c0_7] : memref<8x128xf32, #tpu.memory_space<vmem>>, vector<1x15xf32>
    %c4 = arith.constant 4 : index
    %c0_8 = arith.constant 0 : index
    %6 = vector.load %arg10[%c4, %c0_8] : memref<8x128xf32, #tpu.memory_space<vmem>>, vector<1x10xf32>
    %c0_9 = arith.constant 0 : index
    %c0_10 = arith.constant 0 : index
    %7 = vector.load %arg3[%c0_9, %c0_10] : memref<84x40xf32, #tpu.memory_space<vmem>>, vector<84x40xf32>
    %cst = arith.constant dense<0.000000e+00> : vector<8x40xf32>
    %8 = tpu.matmul %0, %7, %cst {dimension_numbers = #tpu.dot_dimension_numbers<[1], [0], [0], [1], [0, 0, 1, 1], [], []>} : vector<8x84xf32>, vector<84x40xf32>, vector<8x40xf32> -> vector<8x40xf32>
    %9 = vector.broadcast %2 : vector<1x40xf32> to vector<8x40xf32>
    %10 = arith.addf %8, %9 : vector<8x40xf32>
    %11 = math.tanh %10 : vector<8x40xf32>
    %c0_11 = arith.constant 0 : index
    %c0_12 = arith.constant 0 : index
    %12 = vector.load %arg4[%c0_11, %c0_12] : memref<40x60xf32, #tpu.memory_space<vmem>>, vector<40x60xf32>
    %cst_13 = arith.constant dense<0.000000e+00> : vector<8x60xf32>
    %13 = tpu.matmul %11, %12, %cst_13 {dimension_numbers = #tpu.dot_dimension_numbers<[1], [0], [0], [1], [0, 0, 1, 1], [], []>} : vector<8x40xf32>, vector<40x60xf32>, vector<8x60xf32> -> vector<8x60xf32>
    %14 = vector.broadcast %3 : vector<1x60xf32> to vector<8x60xf32>
    %15 = arith.addf %13, %14 : vector<8x60xf32>
    %16 = math.tanh %15 : vector<8x60xf32>
    %17 = arith.truncf %16 : vector<8x60xf32> to vector<8x60xbf16>
    %c0_14 = arith.constant 0 : index
    %c0_15 = arith.constant 0 : index
    %18 = vector.load %arg5[%c0_14, %c0_15] : memref<60x3600xbf16, #tpu.memory_space<vmem>>, vector<60x3600xbf16>
    %cst_16 = arith.constant dense<0.000000e+00> : vector<8x3600xf32>
    %19 = tpu.matmul %17, %18, %cst_16 {dimension_numbers = #tpu.dot_dimension_numbers<[1], [0], [0], [1], [0, 0, 1, 1], [], []>} : vector<8x60xbf16>, vector<60x3600xbf16>, vector<8x3600xf32> -> vector<8x3600xf32>
    %20 = arith.truncf %1 : vector<8x60xf32> to vector<8x60xbf16>
    %c0_17 = arith.constant 0 : index
    %c0_18 = arith.constant 0 : index
    %21 = vector.load %arg6[%c0_17, %c0_18] : memref<60x3600xbf16, #tpu.memory_space<vmem>>, vector<60x3600xbf16>
    %cst_19 = arith.constant dense<0.000000e+00> : vector<8x3600xf32>
    %22 = tpu.matmul %20, %21, %cst_19 {dimension_numbers = #tpu.dot_dimension_numbers<[1], [0], [0], [1], [0, 0, 1, 1], [], []>} : vector<8x60xbf16>, vector<60x3600xbf16>, vector<8x3600xf32> -> vector<8x3600xf32>
    %23 = arith.mulf %19, %22 : vector<8x3600xf32>
    %24 = arith.truncf %23 : vector<8x3600xf32> to vector<8x3600xbf16>
    %c0_20 = arith.constant 0 : index
    %c0_21 = arith.constant 0 : index
    %25 = vector.load %arg7[%c0_20, %c0_21] : memref<3600x60xbf16, #tpu.memory_space<vmem>>, vector<3600x60xbf16>
    %cst_22 = arith.constant dense<0.000000e+00> : vector<8x60xf32>
    %26 = tpu.matmul %24, %25, %cst_22 {dimension_numbers = #tpu.dot_dimension_numbers<[1], [0], [0], [1], [0, 0, 1, 1], [], []>} : vector<8x3600xbf16>, vector<3600x60xbf16>, vector<8x60xf32> -> vector<8x60xf32>
    %27 = vector.broadcast %4 : vector<1x60xf32> to vector<8x60xf32>
    %28 = arith.addf %26, %27 : vector<8x60xf32>
    %c0_23 = arith.constant 0 : index
    %c0_24 = arith.constant 0 : index
    %29 = vector.load %arg8[%c0_23, %c0_24] : memref<60x15xf32, #tpu.memory_space<vmem>>, vector<60x15xf32>
    %cst_25 = arith.constant dense<0.000000e+00> : vector<8x15xf32>
    %30 = tpu.matmul %28, %29, %cst_25 {dimension_numbers = #tpu.dot_dimension_numbers<[1], [0], [0], [1], [0, 0, 1, 1], [], []>} : vector<8x60xf32>, vector<60x15xf32>, vector<8x15xf32> -> vector<8x15xf32>
    %31 = vector.broadcast %5 : vector<1x15xf32> to vector<8x15xf32>
    %32 = arith.addf %30, %31 : vector<8x15xf32>
    %33 = math.tanh %32 : vector<8x15xf32>
    %c0_26 = arith.constant 0 : index
    %c0_27 = arith.constant 0 : index
    %34 = vector.load %arg9[%c0_26, %c0_27] : memref<15x10xf32, #tpu.memory_space<vmem>>, vector<15x10xf32>
    %cst_28 = arith.constant dense<0.000000e+00> : vector<8x10xf32>
    %35 = tpu.matmul %33, %34, %cst_28 {dimension_numbers = #tpu.dot_dimension_numbers<[1], [0], [0], [1], [0, 0, 1, 1], [], []>} : vector<8x15xf32>, vector<15x10xf32>, vector<8x10xf32> -> vector<8x10xf32>
    %36 = vector.broadcast %6 : vector<1x10xf32> to vector<8x10xf32>
    %37 = arith.addf %35, %36 : vector<8x10xf32>
    %38 = math.tanh %37 : vector<8x10xf32>
    %c0_29 = arith.constant 0 : index
    %c0_30 = arith.constant 0 : index
    %39 = vector.load %arg11[%c0_29, %c0_30] : memref<8x10xf32, #tpu.memory_space<vmem>>, vector<8x10xf32>
    tpu.vector_store %arg11[%c0_29, %c0_30], %38 {strides = array<i32>} : memref<8x10xf32, #tpu.memory_space<vmem>>, vector<8x10xf32>,
    return
  }
  func.func @transform_0(%arg0: i32) -> (i32, i32) {
    %c0_i32 = arith.constant 0 : i32
    %c0_i32_0 = arith.constant 0 : i32
    return %arg0, %c0_i32 : i32, i32
  }
  func.func @transform_1(%arg0: i32) -> (i32, i32) {
    %c0_i32 = arith.constant 0 : i32
    %c0_i32_0 = arith.constant 0 : i32
    return %arg0, %c0_i32 : i32, i32
  }
  func.func @transform_2(%arg0: i32) -> (i32, i32) {
    %c0_i32 = arith.constant 0 : i32
    %c0_i32_0 = arith.constant 0 : i32
    %c0_i32_1 = arith.constant 0 : i32
    return %c0_i32, %c0_i32_0 : i32, i32
  }
  func.func @transform_3(%arg0: i32) -> (i32, i32) {
    %c0_i32 = arith.constant 0 : i32
    %c0_i32_0 = arith.constant 0 : i32
    %c0_i32_1 = arith.constant 0 : i32
    return %c0_i32, %c0_i32_0 : i32, i32
  }
  func.func @transform_4(%arg0: i32) -> (i32, i32) {
    %c0_i32 = arith.constant 0 : i32
    %c0_i32_0 = arith.constant 0 : i32
    %c0_i32_1 = arith.constant 0 : i32
    return %c0_i32, %c0_i32_0 : i32, i32
  }
  func.func @transform_5(%arg0: i32) -> (i32, i32) {
    %c0_i32 = arith.constant 0 : i32
    %c0_i32_0 = arith.constant 0 : i32
    %c0_i32_1 = arith.constant 0 : i32
    return %c0_i32, %c0_i32_0 : i32, i32
  }
  func.func @transform_6(%arg0: i32) -> (i32, i32) {
    %c0_i32 = arith.constant 0 : i32
    %c0_i32_0 = arith.constant 0 : i32
    %c0_i32_1 = arith.constant 0 : i32
    return %c0_i32, %c0_i32_0 : i32, i32
  }
  func.func @transform_7(%arg0: i32) -> (i32, i32) {
    %c0_i32 = arith.constant 0 : i32
    %c0_i32_0 = arith.constant 0 : i32
    %c0_i32_1 = arith.constant 0 : i32
    return %c0_i32, %c0_i32_0 : i32, i32
  }
  func.func @transform_8(%arg0: i32) -> (i32, i32) {
    %c0_i32 = arith.constant 0 : i32
    %c0_i32_0 = arith.constant 0 : i32
    %c0_i32_1 = arith.constant 0 : i32
    return %c0_i32, %c0_i32_0 : i32, i32
  }
  func.func @transform_9(%arg0: i32) -> (i32, i32) {
    %c0_i32 = arith.constant 0 : i32
    %c0_i32_0 = arith.constant 0 : i32
    %c0_i32_1 = arith.constant 0 : i32
    return %c0_i32, %c0_i32_0 : i32, i32
  }
  func.func @transform_10(%arg0: i32) -> (i32, i32) {
    %c0_i32 = arith.constant 0 : i32
    %c0_i32_0 = arith.constant 0 : i32
    return %arg0, %c0_i32 : i32, i32
  }
}

</mosaic_0001>

<bundles_post_ra>
// kernel: tpu_custom_call.1
= control target key start
LH: loop header
LB: loop body
LE: loop exit
PB: predicated region body
PF: predicated region fallthrough
CT: control target
= control target key end

     0   :  { %vm63_vm0 = vcmask 1043456   ;;  %v7215_v1 = vmov 0.0   ;;  %vm7216_vm1 = vmmov 0   ;;  %vm59_vm2 = vcmask 687104   ;;  %s9087_s0 = inlined_call_operand.vmem [shape: f32[8,84], index: 0, kind: input, shape index: {}]   ;;  %s9088_s1 = inlined_call_operand.vmem [shape: f32[8,60], index: 1, kind: input, shape index: {}]   ;;  %s9089_s2 = inlined_call_operand.vmem [shape: f32[84,40], index: 2, kind: input, shape index: {}]   ;;  %s9090_s3 = inlined_call_operand.vmem [shape: f32[40,60], index: 3, kind: input, shape index: {}]   ;;  %s9091_s4 = inlined_call_operand.vmem [shape: bf16[60,3600], index: 4, kind: input, shape index: {}]   ;;  %s9092_s5 = inlined_call_operand.vmem [shape: bf16[60,3600], index: 5, kind: input, shape index: {}]   ;;  %s9093_s6 = inlined_call_operand.vmem [shape: bf16[3600,60], index: 6, kind: input, shape index: {}]   ;;  %s9094_s7 = inlined_call_operand.vmem [shape: f32[60,15], index: 7, kind: input, shape index: {}]   ;;  %s9095_s8 = inlined_call_operand.vmem [shape: f32[15,10], index: 8, kind: input, shape index: {}]   ;;  %s9096_s9 = inlined_call_operand.vmem [shape: f32[8,128], index: 9, kind: input, shape index: {}]   ;;  %s9097_s10 = inlined_call_operand.hbm [shape: f32[8,10], index: 10, kind: output, shape index: {}]  }
   0x1   :  { %v54_v0 = vld [vmem:[%s9089_s2 + $0x50] sm:$0xf]  ;;  %6518 = vmatprep.subr.mxu0 %v7215_v1  ;;  %v53_v2 = vld [vmem:[%s9089_s2 + $0x48] sm:$0xff]  ;;  %6543 = vmatprep.subr.mxu1 %v7215_v1  ;;  %v52_v3 = vld [vmem:[%s9089_s2 + $0x40] sm:$0xff]  ;;  %vm147_vm3 = vcmask 326656  }
   0x2   :  { %6519 = vmatpush3.msk.msra.mxu0 %vm63_vm0, %v54_v0  ;;  %6540 = vmatprep.mubr.msk.f32.mxu0 %vm7216_vm1, %v7215_v1  ;;  %v51_v4 = vld [vmem:[%s9089_s2 + $0x38] sm:$0xff]  ;;  %v50_v5 = vld [vmem:[%s9089_s2 + $0x30] sm:$0xff]  ;;  %v49_v6 = vld [vmem:[%s9089_s2 + $0x28] sm:$0xff] }
   0x3   :  { %6520 = vmatprep.subr.mxu0 %v7215_v1  ;;  %6553 = vmatprep.mubr.msk.f32.mxu1 %vm7216_vm1, %v7215_v1  ;;  %v48_v7 = vld [vmem:[%s9089_s2 + $0x20] sm:$0xff]  ;;  %v47_v8 = vld [vmem:[%s9089_s2 + $0x18] sm:$0xff]  ;;  %v46_v9 = vld [vmem:[%s9089_s2 + $0x10] sm:$0xff] }
   0x4   :  { %6521 = vmatpush3.msra.mxu0 %v53_v2  ;;  %v45_v10 = vld [vmem:[%s9089_s2 + $0x8] sm:$0xff]  ;;  %v44_v11 = vld [vmem:[%s9089_s2] sm:$0xff]  ;;  %v141_v14 = vld [vmem:[%s9090_s3 + $0x18] sm:$0xff] }
   0x5   :  { %6522 = vmatprep.subr.mxu0 %v7215_v1  ;;  %v37_v12 = vld [vmem:[%s9087_s0] sm:$0xff]  ;;  %v140_v15 = vld [vmem:[%s9090_s3 + $0x10] sm:$0xff]  ;;  %v139_v16 = vld [vmem:[%s9090_s3 + $0x8] sm:$0xff] }
   0x6   :  { %6523 = vmatpush3.msra.mxu0 %v52_v3  ;;  %v142_v13 = vld [vmem:[%s9090_s3 + $0x20] sm:$0xff] }
   0x7   :  { %6524 = vmatprep.subr.mxu0 %v7215_v1  ;;  %6544 = vmatpush3.msra.mxu1 %v142_v13  ;;  %v138_v17 = vld [vmem:[%s9090_s3] sm:$0xff] }
   0x8   :  { %6525 = vmatpush3.msra.mxu0 %v51_v4  ;;  %6545 = vmatprep.subr.mxu1 %v7215_v1  ;;  %v5640_v18 = vld [vmem:[%s9096_s9] ss:$0 sm:$0xff] }
   0x9   :  { %6526 = vmatprep.subr.mxu0 %v7215_v1  ;;  %6546 = vmatpush3.msra.mxu1 %v141_v14 }
   0xa   :  { %6527 = vmatpush3.msra.mxu0 %v50_v5  ;;  %6547 = vmatprep.subr.mxu1 %v7215_v1 }
   0xb   :  { %6528 = vmatprep.subr.mxu0 %v7215_v1  ;;  %6548 = vmatpush3.msra.mxu1 %v140_v15 }
   0xc   :  { %6529 = vmatpush3.msra.mxu0 %v49_v6  ;;  %6549 = vmatprep.subr.mxu1 %v7215_v1 }
   0xd   :  { %6530 = vmatprep.subr.mxu0 %v7215_v1  ;;  %6550 = vmatpush3.msra.mxu1 %v139_v16 }
   0xe   :  { %6531 = vmatpush3.msra.mxu0 %v48_v7  ;;  %6551 = vmatprep.subr.mxu1 %v7215_v1 }
   0xf   :  { %6532 = vmatprep.subr.mxu0 %v7215_v1  ;;  %6552 = vmatpush3.msra.mxu1 %v138_v17 }
  0x10   :  { %6533 = vmatpush3.msra.mxu0 %v47_v8 }
  0x11   :  { %6534 = vmatprep.subr.mxu0 %v7215_v1 }
  0x12   :  { %6535 = vmatpush3.msra.mxu0 %v46_v9 }
  0x13   :  { %6536 = vmatprep.subr.mxu0 %v7215_v1 }
  0x14   :  { %6537 = vmatpush3.msra.mxu0 %v45_v10 }
  0x15   :  { %6538 = vmatprep.subr.mxu0 %v7215_v1 }
  0x16   :  { %6539 = vmatpush3.msra.mxu0 %v44_v11 }
  0x17   :  { %6541 = vmatmul.mubr.msk.f32.vlgmr.msra.gmra.mxu0 %vm59_vm2, %v37_v12 }
  0xd7   :  { %v133_v19 = vpop.f32.mrf.mxu0 }
  0xd8   :  { %v134_v20 = vadd.f32 %v5640_v18, %v133_v19 }
  0xd9   :  { %v6542_v21 = vpop.f32.mrf.mxu0 }
  0xda   :  { %7185 = vtanh.f32 %v134_v20 }
  0xe7   :  { %v7186_v22 = vpop.eup %7185 }
  0xe8   :  { %6554 = vmatmul.mubr.msk.f32.vlgmr.msra.gmra.mxu1 %vm147_vm3, %v7186_v22 }
  0xe9   :  { %15 = vsyncpa [#allocation3], 0  ;;  %v6616_v23 = vld [vmem:[%s9091_s4 + $0x2bc] ss:$116 sps:$4 sm:$0x3f]   ;;  %vm902_vm4 = vcmask 1045504  }
  0xea   :  { %v6618_v24 = vld [vmem:[%s9091_s4 + $0x2c4] ss:$116 sps:$4 sm:$0x3f]   ;;  %5761 = vmatprep.subr.msk.bf16.mxu1 %vm902_vm4, %v6616_v23  ;;  %v6621_v26 = vld [vmem:[%s9091_s4 + $0x2c0] ss:$116 sps:$4 sm:$0x3f]  }
  0xeb   :  { %v6620_v25 = vld [vmem:[%s9091_s4 + $0x2b8] ss:$116 sps:$4 sm:$0x3f]   ;;  %5763 = vmatprep.subr.msk.bf16.mxu0 %vm902_vm4, %v6618_v24  ;;  %v910_v28 = vsel %vm902_vm4, %v6621_v26, 0  ;;  %v6624_v29 = vld [vmem:[%s9091_s4 + $0x1d4] ss:$116 sps:$4 sm:$0xff]  }
  0xec   :  { %v904_v27 = vsel %vm902_vm4, %v6620_v25, 0  ;;  %v6627_v30 = vld [vmem:[%s9091_s4 + $0x1dc] ss:$116 sps:$4 sm:$0xff]   ;;  %1040 = vmatpush1.bf16.msra.mxu0 %v910_v28  ;;  %v6625_v32 = vld [vmem:[%s9091_s4 + $0x1d8] ss:$116 sps:$4 sm:$0xff]   ;;  %v7217_v43 = vmov 0  }
  0xed   :  { %999 = vmatpush1.bf16.msra.mxu1 %v904_v27  ;;  %v6622_v31 = vld [vmem:[%s9091_s4 + $0x1d0] ss:$116 sps:$4 sm:$0xff]   ;;  %1041 = vmatprep.subr.bf16.mxu0 %v6627_v30  ;;  %v6630_v33 = vld [vmem:[%s9091_s4 + $0xec] ss:$116 sps:$4 sm:$0xff]   ;;  %v6633_v34 = vld [vmem:[%s9091_s4 + $0xf4] ss:$116 sps:$4 sm:$0xff]  }
  0xee   :  { %1000 = vmatprep.subr.bf16.mxu1 %v6624_v29  ;;  %v6628_v35 = vld [vmem:[%s9091_s4 + $0xe8] ss:$116 sps:$4 sm:$0xff]   ;;  %v6631_v36 = vld [vmem:[%s9091_s4 + $0xf0] ss:$116 sps:$4 sm:$0xff]   ;;  %v6639_v38 = vld [vmem:[%s9091_s4 + $0xc] ss:$116 sps:$4 sm:$0xff]   ;;  %1022 = vmatprep.mubr.bf16.mxu1 %v7217_v43 }
  0xef   :  { %v6636_v37 = vld [vmem:[%s9091_s4 + $0x4] ss:$116 sps:$4 sm:$0xff]   ;;  %v6634_v39 = vld [vmem:[%s9091_s4] ss:$116 sps:$4 sm:$0xff]   ;;  %v6637_v40 = vld [vmem:[%s9091_s4 + $0x8] ss:$116 sps:$4 sm:$0xff]   ;;  %1063 = vmatprep.mubr.bf16.mxu0 %v7217_v43 }
  0xf0   :  { %1042 = vmatpush1.bf16.msra.mxu0 %v6625_v32  ;;  %v6640_v41 = vld [vmem:[%s9091_s4 + $0x2cc] ss:$116 sps:$4 sm:$0x3f]   ;;  %v6642_v42 = vld [vmem:[%s9091_s4 + $0x2d4] ss:$116 sps:$4 sm:$0x3f]  }
  0xf1   :  { %1001 = vmatpush1.bf16.msra.mxu1 %v6622_v31  ;;  %1043 = vmatprep.subr.bf16.mxu0 %v6633_v34  ;;  %v5643_v44 = vld [vmem:[%s9096_s9 + $0x1] ss:$0 sm:$0xff]  ;;  %v6644_v48 = vld [vmem:[%s9091_s4 + $0x2c8] ss:$116 sps:$4 sm:$0x3f]   ;;  %vm898_vm5 = vcmask 490496  }
  0xf2   :  { %1002 = vmatprep.subr.bf16.mxu1 %v6630_v33  ;;  %v6645_v49 = vld [vmem:[%s9091_s4 + $0x2d0] ss:$116 sps:$4 sm:$0x3f]   ;;  %v916_v52 = vsel %vm902_vm4, %v6644_v48, 0  ;;  %v6651_v55 = vld [vmem:[%s9091_s4 + $0x1ec] ss:$116 sps:$4 sm:$0xff]  }
  0xf3   :  { %v922_v53 = vsel %vm902_vm4, %v6645_v49, 0  ;;  %v6648_v54 = vld [vmem:[%s9091_s4 + $0x1e4] ss:$116 sps:$4 sm:$0xff]   ;;  %v6646_v56 = vld [vmem:[%s9091_s4 + $0x1e0] ss:$116 sps:$4 sm:$0xff]   ;;  %vm4846_vm6 = vcmask 130048  }
  0xf4   :  { %1044 = vmatpush1.bf16.msra.mxu0 %v6631_v36  ;;  %v6649_v57 = vld [vmem:[%s9091_s4 + $0x1e8] ss:$116 sps:$4 sm:$0xff]   ;;  %v6657_v59 = vld [vmem:[%s9091_s4 + $0x104] ss:$116 sps:$4 sm:$0xff]   ;;  %v6655_v61 = vld [vmem:[%s9091_s4 + $0x100] ss:$116 sps:$4 sm:$0xff]  }
  0xf5   :  { %1003 = vmatpush1.bf16.msra.mxu1 %v6628_v35  ;;  %1045 = vmatprep.subr.bf16.mxu0 %v6639_v38  ;;  %v6654_v58 = vld [vmem:[%s9091_s4 + $0xfc] ss:$116 sps:$4 sm:$0xff]   ;;  %v6652_v60 = vld [vmem:[%s9091_s4 + $0xf8] ss:$116 sps:$4 sm:$0xff]   ;;  %v6660_v62 = vld [vmem:[%s9091_s4 + $0x14] ss:$116 sps:$4 sm:$0xff]  }
  0xf6   :  { %1004 = vmatprep.subr.bf16.mxu1 %v6636_v37  ;;  %v6663_v63 = vld [vmem:[%s9091_s4 + $0x1c] ss:$116 sps:$4 sm:$0xff]   ;;  %v6661_v2 = vld [vmem:[%s9091_s4 + $0x18] ss:$116 sps:$4 sm:$0xff]   ;;  %v6672_v9 = vld [vmem:[%s9091_s4 + $0x1f4] ss:$116 sps:$4 sm:$0xff]  }
  0xf7   :  { %v6658_v0 = vld [vmem:[%s9091_s4 + $0x10] ss:$116 sps:$4 sm:$0xff]   ;;  %v6668_v5 = vld [vmem:[%s9091_s4 + $0x2d8] ss:$116 sps:$4 sm:$0x3f]   ;;  %vm5549_vm7 = vcmask 1046528  }
  0xf8   :  { %1046 = vmatpush1.bf16.msra.mxu0 %v6637_v40  ;;  %v6664_v3 = vld [vmem:[%s9091_s4 + $0x2dc] ss:$116 sps:$4 sm:$0x3f]   ;;  %v6666_v4 = vld [vmem:[%s9091_s4 + $0x2e4] ss:$116 sps:$4 sm:$0x3f]  }
  0xf9   :  { %1005 = vmatpush1.bf16.msra.mxu1 %v6634_v39  ;;  %5767 = vmatprep.subr.msk.bf16.mxu0 %vm902_vm4, %v6642_v42  ;;  %v6669_v6 = vld [vmem:[%s9091_s4 + $0x2e0] ss:$116 sps:$4 sm:$0x3f]   ;;  %v928_v7 = vsel %vm902_vm4, %v6668_v5, 0  ;;  %v6675_v10 = vld [vmem:[%s9091_s4 + $0x1fc] ss:$116 sps:$4 sm:$0xff]  }
  0xfa   :  { %5765 = vmatprep.subr.msk.bf16.mxu1 %vm902_vm4, %v6640_v41  ;;  %v934_v8 = vsel %vm902_vm4, %v6669_v6, 0  ;;  %v6670_v11 = vld [vmem:[%s9091_s4 + $0x1f0] ss:$116 sps:$4 sm:$0xff]   ;;  %v6673_v12 = vld [vmem:[%s9091_s4 + $0x1f8] ss:$116 sps:$4 sm:$0xff]   ;;  %vm5545_vm8 = vcmask 121856  }
  0xfb   :  { %v6678_v13 = vld [vmem:[%s9091_s4 + $0x10c] ss:$116 sps:$4 sm:$0xff]   ;;  %v6681_v14 = vld [vmem:[%s9091_s4 + $0x114] ss:$116 sps:$4 sm:$0xff]   ;;  %v6679_v16 = vld [vmem:[%s9091_s4 + $0x110] ss:$116 sps:$4 sm:$0xff]  }
  0xfc   :  { %v6676_v15 = vld [vmem:[%s9091_s4 + $0x108] ss:$116 sps:$4 sm:$0xff]   ;;  %v6684_v17 = vld [vmem:[%s9091_s4 + $0x24] ss:$116 sps:$4 sm:$0xff]   ;;  %v6687_v18 = vld [vmem:[%s9091_s4 + $0x2c] ss:$116 sps:$4 sm:$0xff]  }
  0xfd   :  { %v6682_v19 = vld [vmem:[%s9091_s4 + $0x20] ss:$116 sps:$4 sm:$0xff]   ;;  %v6685_v20 = vld [vmem:[%s9091_s4 + $0x28] ss:$116 sps:$4 sm:$0xff]   ;;  %v6696_v27 = vld [vmem:[%s9091_s4 + $0x204] ss:$116 sps:$4 sm:$0xff]  }
  0xfe   :  { %v6688_v21 = vld [vmem:[%s9091_s4 + $0x2ec] ss:$116 sps:$4 sm:$0x3f]   ;;  %v6690_v22 = vld [vmem:[%s9091_s4 + $0x2f4] ss:$116 sps:$4 sm:$0x3f]  }
  0xff   :  { %v6692_v23 = vld [vmem:[%s9091_s4 + $0x2e8] ss:$116 sps:$4 sm:$0x3f]   ;;  %v6693_v24 = vld [vmem:[%s9091_s4 + $0x2f0] ss:$116 sps:$4 sm:$0x3f]  }
 0x100   :  { %v940_v25 = vsel %vm902_vm4, %v6692_v23, 0  ;;  %v946_v26 = vsel %vm902_vm4, %v6693_v24, 0  ;;  %v6699_v28 = vld [vmem:[%s9091_s4 + $0x20c] ss:$116 sps:$4 sm:$0xff]   ;;  %v6697_v30 = vld [vmem:[%s9091_s4 + $0x208] ss:$116 sps:$4 sm:$0xff]  }
 0x101   :  { %v6694_v29 = vld [vmem:[%s9091_s4 + $0x200] ss:$116 sps:$4 sm:$0xff]   ;;  %v6702_v31 = vld [vmem:[%s9091_s4 + $0x11c] ss:$116 sps:$4 sm:$0xff]   ;;  %v6705_v32 = vld [vmem:[%s9091_s4 + $0x124] ss:$116 sps:$4 sm:$0xff]  }
 0x102   :  { %v6700_v33 = vld [vmem:[%s9091_s4 + $0x118] ss:$116 sps:$4 sm:$0xff]   ;;  %v6703_v34 = vld [vmem:[%s9091_s4 + $0x120] ss:$116 sps:$4 sm:$0xff]   ;;  %v6711_v36 = vld [vmem:[%s9091_s4 + $0x3c] ss:$116 sps:$4 sm:$0xff]  }
 0x103   :  { %v6708_v35 = vld [vmem:[%s9091_s4 + $0x34] ss:$116 sps:$4 sm:$0xff]   ;;  %v6706_v37 = vld [vmem:[%s9091_s4 + $0x30] ss:$116 sps:$4 sm:$0xff]   ;;  %v6709_v38 = vld [vmem:[%s9091_s4 + $0x38] ss:$116 sps:$4 sm:$0xff]  }
 0x104   :  { %v6712_v39 = vld [vmem:[%s9091_s4 + $0x2fc] ss:$116 sps:$4 sm:$0x3f]   ;;  %v6714_v40 = vld [vmem:[%s9091_s4 + $0x304] ss:$116 sps:$4 sm:$0x3f]  }
 0x105   :  { %v6716_v41 = vld [vmem:[%s9091_s4 + $0x2f8] ss:$116 sps:$4 sm:$0x3f]   ;;  %v6717_v42 = vld [vmem:[%s9091_s4 + $0x300] ss:$116 sps:$4 sm:$0x3f]  }
 0x106   :  { %v6718_v48 = vld [vmem:[%s9091_s4 + $0x210] ss:$116 sps:$4 sm:$0xff]   ;;  %v6721_v49 = vld [vmem:[%s9091_s4 + $0x218] ss:$116 sps:$4 sm:$0xff]   ;;  %v6745_v5 = vld [vmem:[%s9091_s4 + $0x228] ss:$116 sps:$4 sm:$0xff]  }
 0x107   :  { %v6750_v6 = vld [vmem:[%s9091_s4 + $0x13c] ss:$116 sps:$4 sm:$0xff]   ;;  %v6769_v23 = vld [vmem:[%s9091_s4 + $0x238] ss:$116 sps:$4 sm:$0xff]   ;;  %vm5624_vm9 = vcmask 80896  }
 0x108   :  { %v6774_v24 = vld [vmem:[%s9091_s4 + $0x14c] ss:$116 sps:$4 sm:$0xff]  }
 0x1a8   :  { %v217_v45 = vpop.f32.mrf.mxu1 }
 0x1a9   :  { %v218_v46 = vadd.f32 %v5643_v44, %v217_v45  ;;  %v952_v44 = vsel %vm902_vm4, %v6716_v41, 0  ;;  %v958_v45 = vsel %vm902_vm4, %v6717_v42, 0  ;;  %v6792_v41 = vld [vmem:[%s9092_s5 + $0xe8] ss:$116 sps:$4 sm:$0xff]   ;;  %v6795_v42 = vld [vmem:[%s9091_s4 + $0x158] ss:$116 sps:$4 sm:$0xff]  }
 0x1aa   :  { %v6555_v47 = vpop.f32.mrf.mxu1 }
 0x1ab   :  { %7187 = vtanh.f32 %v218_v46  ;;  %v6720_v46 = vld [vmem:[%s9091_s4 + $0x214] ss:$116 sps:$4 sm:$0xff]   ;;  %v6723_v47 = vld [vmem:[%s9091_s4 + $0x21c] ss:$116 sps:$4 sm:$0xff]  }
 0x1b8   :  { %v7188_v50 = vpop.eup %7187 }
 0x1b9   :  { %v7420_v51 = vpack.c.bf16 %v7188_v50, %v7188_v50  ;;  %v6726_v50 = vld [vmem:[%s9091_s4 + $0x12c] ss:$116 sps:$4 sm:$0xff]  }
 0x1bb   :  { %5762 = vmatmul.mubr.msk.bf16.vlgmr.msra.gmra.mxu1 %vm898_vm5, %v7420_v51  ;;  %5764 = vmatmul.mubr.msk.bf16.vlgmr.msra.gmra.mxu0 %vm898_vm5, %v7420_v51 }
 0x1bc   :  { %1081 = vmatpush1.bf16.msra.mxu1 %v916_v52  ;;  %1122 = vmatpush1.bf16.msra.mxu0 %v922_v53  ;;  %v6729_v52 = vld [vmem:[%s9091_s4 + $0x134] ss:$116 sps:$4 sm:$0xff]  }
 0x1bd   :  { %1082 = vmatprep.subr.bf16.mxu1 %v6648_v54  ;;  %1123 = vmatprep.subr.bf16.mxu0 %v6651_v55  ;;  %v6724_v53 = vld [vmem:[%s9091_s4 + $0x128] ss:$116 sps:$4 sm:$0xff]   ;;  %v6727_v54 = vld [vmem:[%s9091_s4 + $0x130] ss:$116 sps:$4 sm:$0xff]  }
 0x1be   :  { %1104 = vmatprep.mubr.bf16.mxu1 %v7217_v43  ;;  %1145 = vmatprep.mubr.bf16.mxu0 %v7217_v43  ;;  %v6732_v55 = vld [vmem:[%s9091_s4 + $0x44] ss:$116 sps:$4 sm:$0xff]  }
 0x1c0   :  { %1083 = vmatpush1.bf16.msra.mxu1 %v6646_v56  ;;  %1124 = vmatpush1.bf16.msra.mxu0 %v6649_v57  ;;  %v6735_v56 = vld [vmem:[%s9091_s4 + $0x4c] ss:$116 sps:$4 sm:$0xff]  }
 0x1c1   :  { %1084 = vmatprep.subr.bf16.mxu1 %v6654_v58  ;;  %1125 = vmatprep.subr.bf16.mxu0 %v6657_v59  ;;  %v6730_v57 = vld [vmem:[%s9091_s4 + $0x40] ss:$116 sps:$4 sm:$0xff]   ;;  %v6733_v58 = vld [vmem:[%s9091_s4 + $0x48] ss:$116 sps:$4 sm:$0xff]  }
 0x1c2   :  { %v6736_v59 = vld [vmem:[%s9091_s4 + $0x30c] ss:$116 sps:$4 sm:$0x3f]  }
 0x1c4   :  { %1085 = vmatpush1.bf16.msra.mxu1 %v6652_v60  ;;  %1126 = vmatpush1.bf16.msra.mxu0 %v6655_v61  ;;  %v6738_v60 = vld [vmem:[%s9091_s4 + $0x314] ss:$116 sps:$4 sm:$0x3f]  }
 0x1c5   :  { %1086 = vmatprep.subr.bf16.mxu1 %v6660_v62  ;;  %1127 = vmatprep.subr.bf16.mxu0 %v6663_v63  ;;  %v6740_v61 = vld [vmem:[%s9091_s4 + $0x308] ss:$116 sps:$4 sm:$0x3f]   ;;  %v6741_v62 = vld [vmem:[%s9091_s4 + $0x310] ss:$116 sps:$4 sm:$0x3f]  }
 0x1c6   :  { %v964_v63 = vsel %vm902_vm4, %v6740_v61, 0  ;;  %v6812_v61 = vld [vmem:[%s9092_s5 + $0xf0] ss:$116 sps:$4 sm:$0xff]  }
 0x1c8   :  { %1087 = vmatpush1.bf16.msra.mxu1 %v6658_v0  ;;  %1128 = vmatpush1.bf16.msra.mxu0 %v6661_v2  ;;  %v970_v0 = vsel %vm902_vm4, %v6741_v62, 0  ;;  %v6744_v2 = vld [vmem:[%s9091_s4 + $0x224] ss:$116 sps:$4 sm:$0xff]  }
 0x1c9   :  { %5769 = vmatprep.subr.msk.bf16.mxu1 %vm902_vm4, %v6664_v3  ;;  %5771 = vmatprep.subr.msk.bf16.mxu0 %vm902_vm4, %v6666_v4  ;;  %v6747_v3 = vld [vmem:[%s9091_s4 + $0x22c] ss:$116 sps:$4 sm:$0xff]  }
 0x1ca   :  { %v6742_v4 = vld [vmem:[%s9091_s4 + $0x220] ss:$116 sps:$4 sm:$0xff]   ;;  %v6815_v62 = vld [vmem:[%s9092_s5 + $0xf8] ss:$116 sps:$4 sm:$0xff]  }
 0x1cb   :  { %5766 = vmatmul.mubr.msk.bf16.vlgmr.msra.gmra.mxu1 %vm898_vm5, %v7420_v51  ;;  %5768 = vmatmul.mubr.msk.bf16.vlgmr.msra.gmra.mxu0 %vm898_vm5, %v7420_v51 }
 0x1cc   :  { %1163 = vmatpush1.bf16.msra.mxu1 %v928_v7  ;;  %1204 = vmatpush1.bf16.msra.mxu0 %v934_v8  ;;  %v6753_v7 = vld [vmem:[%s9091_s4 + $0x144] ss:$116 sps:$4 sm:$0xff]  }
 0x1cd   :  { %1164 = vmatprep.subr.bf16.mxu1 %v6672_v9  ;;  %1205 = vmatprep.subr.bf16.mxu0 %v6675_v10  ;;  %v6748_v8 = vld [vmem:[%s9091_s4 + $0x138] ss:$116 sps:$4 sm:$0xff]   ;;  %v6751_v9 = vld [vmem:[%s9091_s4 + $0x140] ss:$116 sps:$4 sm:$0xff]  }
 0x1ce   :  { %1186 = vmatprep.mubr.bf16.mxu1 %v7217_v43  ;;  %1227 = vmatprep.mubr.bf16.mxu0 %v7217_v43  ;;  %v6756_v10 = vld [vmem:[%s9091_s4 + $0x54] ss:$116 sps:$4 sm:$0xff]  }
 0x1d0   :  { %1165 = vmatpush1.bf16.msra.mxu1 %v6670_v11  ;;  %1206 = vmatpush1.bf16.msra.mxu0 %v6673_v12  ;;  %v6759_v11 = vld [vmem:[%s9091_s4 + $0x5c] ss:$116 sps:$4 sm:$0xff]  }
 0x1d1   :  { %1166 = vmatprep.subr.bf16.mxu1 %v6678_v13  ;;  %1207 = vmatprep.subr.bf16.mxu0 %v6681_v14  ;;  %v6754_v12 = vld [vmem:[%s9091_s4 + $0x50] ss:$116 sps:$4 sm:$0xff]   ;;  %v6757_v13 = vld [vmem:[%s9091_s4 + $0x58] ss:$116 sps:$4 sm:$0xff]  }
 0x1d2   :  { %v6760_v14 = vld [vmem:[%s9091_s4 + $0x31c] ss:$116 sps:$4 sm:$0x3f]  }
 0x1d4   :  { %1167 = vmatpush1.bf16.msra.mxu1 %v6676_v15  ;;  %1208 = vmatpush1.bf16.msra.mxu0 %v6679_v16  ;;  %v6762_v15 = vld [vmem:[%s9091_s4 + $0x324] ss:$116 sps:$4 sm:$0x3f]  }
 0x1d5   :  { %1168 = vmatprep.subr.bf16.mxu1 %v6684_v17  ;;  %1209 = vmatprep.subr.bf16.mxu0 %v6687_v18  ;;  %v6764_v16 = vld [vmem:[%s9091_s4 + $0x318] ss:$116 sps:$4 sm:$0x3f]   ;;  %v6765_v17 = vld [vmem:[%s9091_s4 + $0x320] ss:$116 sps:$4 sm:$0x3f]  }
 0x1d6   :  { %v976_v18 = vsel %vm902_vm4, %v6764_v16, 0  ;;  %v6836_v16 = vld [vmem:[%s9092_s5 + $0x100] ss:$116 sps:$4 sm:$0xff]  }
 0x1d8   :  { %1169 = vmatpush1.bf16.msra.mxu1 %v6682_v19  ;;  %1210 = vmatpush1.bf16.msra.mxu0 %v6685_v20  ;;  %v982_v19 = vsel %vm902_vm4, %v6765_v17, 0  ;;  %v6768_v20 = vld [vmem:[%s9091_s4 + $0x234] ss:$116 sps:$4 sm:$0xff]  }
 0x1d9   :  { %5773 = vmatprep.subr.msk.bf16.mxu1 %vm902_vm4, %v6688_v21  ;;  %5775 = vmatprep.subr.msk.bf16.mxu0 %vm902_vm4, %v6690_v22  ;;  %v6771_v21 = vld [vmem:[%s9091_s4 + $0x23c] ss:$116 sps:$4 sm:$0xff]  }
 0x1da   :  { %v6766_v22 = vld [vmem:[%s9091_s4 + $0x230] ss:$116 sps:$4 sm:$0xff]   ;;  %v6839_v17 = vld [vmem:[%s9092_s5 + $0x108] ss:$116 sps:$4 sm:$0xff]  }
 0x1db   :  { %5770 = vmatmul.mubr.msk.bf16.vlgmr.msra.gmra.mxu1 %vm898_vm5, %v7420_v51  ;;  %5772 = vmatmul.mubr.msk.bf16.vlgmr.msra.gmra.mxu0 %vm898_vm5, %v7420_v51 }
 0x1dc   :  { %1245 = vmatpush1.bf16.msra.mxu1 %v940_v25  ;;  %1286 = vmatpush1.bf16.msra.mxu0 %v946_v26  ;;  %v6777_v25 = vld [vmem:[%s9091_s4 + $0x154] ss:$116 sps:$4 sm:$0xff]  }
 0x1dd   :  { %1246 = vmatprep.subr.bf16.mxu1 %v6696_v27  ;;  %1287 = vmatprep.subr.bf16.mxu0 %v6699_v28  ;;  %v6772_v26 = vld [vmem:[%s9091_s4 + $0x148] ss:$116 sps:$4 sm:$0xff]   ;;  %v6775_v27 = vld [vmem:[%s9091_s4 + $0x150] ss:$116 sps:$4 sm:$0xff]  }
 0x1de   :  { %1268 = vmatprep.mubr.bf16.mxu1 %v7217_v43  ;;  %1309 = vmatprep.mubr.bf16.mxu0 %v7217_v43  ;;  %v6780_v28 = vld [vmem:[%s9091_s4 + $0x64] ss:$116 sps:$4 sm:$0xff]  }
 0x1e0   :  { %1247 = vmatpush1.bf16.msra.mxu1 %v6694_v29  ;;  %1288 = vmatpush1.bf16.msra.mxu0 %v6697_v30  ;;  %v6783_v29 = vld [vmem:[%s9091_s4 + $0x6c] ss:$116 sps:$4 sm:$0xff]  }
 0x1e1   :  { %1248 = vmatprep.subr.bf16.mxu1 %v6702_v31  ;;  %1289 = vmatprep.subr.bf16.mxu0 %v6705_v32  ;;  %v6778_v30 = vld [vmem:[%s9091_s4 + $0x60] ss:$116 sps:$4 sm:$0xff]   ;;  %v6781_v31 = vld [vmem:[%s9091_s4 + $0x68] ss:$116 sps:$4 sm:$0xff]  }
 0x1e2   :  { %v6784_v32 = vld [vmem:[%s9092_s5 + $0x2bc] ss:$116 sps:$4 sm:$0x3f]  }
 0x1e4   :  { %1249 = vmatpush1.bf16.msra.mxu1 %v6700_v33  ;;  %1290 = vmatpush1.bf16.msra.mxu0 %v6703_v34  ;;  %v6786_v33 = vld [vmem:[%s9091_s4 + $0x328] ss:$116 sps:$4 sm:$0x3f]   ;;  %v6787_v34 = vld [vmem:[%s9092_s5 + $0x2b8] ss:$116 sps:$4 sm:$0x3f]  }
 0x1e5   :  { %1250 = vmatprep.subr.bf16.mxu1 %v6708_v35  ;;  %1291 = vmatprep.subr.bf16.mxu0 %v6711_v36  ;;  %v988_v35 = vsel %vm902_vm4, %v6786_v33, 0  ;;  %v2284_v36 = vsel %vm902_vm4, %v6787_v34, 0  ;;  %v6865_v33 = vld [vmem:[%s9092_s5 + $0x11c] ss:$116 sps:$4 sm:$0xff]  }
 0x1e6   :  { %v6860_v34 = vld [vmem:[%s9092_s5 + $0x110] ss:$116 sps:$4 sm:$0xff]  }
 0x1e8   :  { %1251 = vmatpush1.bf16.msra.mxu1 %v6706_v37  ;;  %1292 = vmatpush1.bf16.msra.mxu0 %v6709_v38  ;;  %v6790_v37 = vld [vmem:[%s9092_s5 + $0x1d4] ss:$116 sps:$4 sm:$0xff]   ;;  %v6788_v38 = vld [vmem:[%s9092_s5 + $0x1d0] ss:$116 sps:$4 sm:$0xff]  }
 0x1e9   :  { %5777 = vmatprep.subr.msk.bf16.mxu1 %vm902_vm4, %v6712_v39  ;;  %5779 = vmatprep.subr.msk.bf16.mxu0 %vm902_vm4, %v6714_v40  ;;  %v6791_v39 = vld [vmem:[%s9091_s4 + $0x240] ss:$116 sps:$4 sm:$0xff]  }
 0x1ea   :  { %v6794_v40 = vld [vmem:[%s9092_s5 + $0xec] ss:$116 sps:$4 sm:$0xff]  }
 0x1eb   :  { %5774 = vmatmul.mubr.msk.bf16.vlgmr.msra.gmra.mxu1 %vm898_vm5, %v7420_v51  ;;  %5776 = vmatmul.mubr.msk.bf16.vlgmr.msra.gmra.mxu0 %vm898_vm5, %v7420_v51 }
 0x1ec   :  { %1327 = vmatpush1.bf16.msra.mxu1 %v952_v44  ;;  %1368 = vmatpush1.bf16.msra.mxu0 %v958_v45  ;;  %v6798_v44 = vld [vmem:[%s9092_s5 + $0x4] ss:$116 sps:$4 sm:$0xff]   ;;  %v6796_v45 = vld [vmem:[%s9092_s5] ss:$116 sps:$4 sm:$0xff]  }
 0x1ed   :  { %1328 = vmatprep.subr.bf16.mxu1 %v6720_v46  ;;  %1369 = vmatprep.subr.bf16.mxu0 %v6723_v47  ;;  %v6799_v46 = vld [vmem:[%s9091_s4 + $0x70] ss:$116 sps:$4 sm:$0xff]  }
 0x1ee   :  { %1350 = vmatprep.mubr.bf16.mxu1 %v7217_v43  ;;  %1391 = vmatprep.mubr.bf16.mxu0 %v7217_v43  ;;  %v38_v47 = vld [vmem:[%s9088_s1] sm:$0xff] }
 0x1f0   :  { %1329 = vmatpush1.bf16.msra.mxu1 %v6718_v48  ;;  %1370 = vmatpush1.bf16.msra.mxu0 %v6721_v49  ;;  %v6800_v48 = vld [vmem:[%s9092_s5 + $0x2c4] ss:$116 sps:$4 sm:$0x3f]   ;;  %v6802_v49 = vld [vmem:[%s9092_s5 + $0x2cc] ss:$116 sps:$4 sm:$0x3f]  }
 0x1f1   :  { %1330 = vmatprep.subr.bf16.mxu1 %v6726_v50  ;;  %1371 = vmatprep.subr.bf16.mxu0 %v6729_v52  ;;  %v6804_v50 = vld [vmem:[%s9092_s5 + $0x2c0] ss:$116 sps:$4 sm:$0x3f]   ;;  %v6805_v52 = vld [vmem:[%s9092_s5 + $0x2c8] ss:$116 sps:$4 sm:$0x3f]  }
 0x1f4   :  { %1331 = vmatpush1.bf16.msra.mxu1 %v6724_v53  ;;  %1372 = vmatpush1.bf16.msra.mxu0 %v6727_v54  ;;  %v7821_v53 = vpack.c.bf16 %v38_v47, %v38_v47  ;;  %v2290_v54 = vsel %vm902_vm4, %v6804_v50, 0  ;;  %v6880_v47 = vld [vmem:[%s9092_s5 + $0x20c] ss:$116 sps:$4 sm:$0xff]   ;;  %v6881_v50 = vld [vmem:[%s9092_s5 + $0x210] ss:$116 sps:$4 sm:$0xff]  }
 0x1f5   :  { %1332 = vmatprep.subr.bf16.mxu1 %v6732_v55  ;;  %1373 = vmatprep.subr.bf16.mxu0 %v6735_v56  ;;  %v2296_v55 = vsel %vm902_vm4, %v6805_v52, 0  ;;  %v6808_v56 = vld [vmem:[%s9092_s5 + $0x1dc] ss:$116 sps:$4 sm:$0xff]   ;;  %v6886_v52 = vld [vmem:[%s9092_s5 + $0x124] ss:$116 sps:$4 sm:$0xff]  }
 0x1f8   :  { %1333 = vmatpush1.bf16.msra.mxu1 %v6730_v57  ;;  %1374 = vmatpush1.bf16.msra.mxu0 %v6733_v58  ;;  %v6811_v57 = vld [vmem:[%s9092_s5 + $0x1e4] ss:$116 sps:$4 sm:$0xff]  }
 0x1f9   :  { %5781 = vmatprep.subr.msk.bf16.mxu1 %vm902_vm4, %v6736_v59  ;;  %5783 = vmatprep.subr.msk.bf16.mxu0 %vm902_vm4, %v6738_v60  ;;  %v6806_v58 = vld [vmem:[%s9092_s5 + $0x1d8] ss:$116 sps:$4 sm:$0xff]   ;;  %v6809_v59 = vld [vmem:[%s9092_s5 + $0x1e0] ss:$116 sps:$4 sm:$0xff]  }
 0x1fa   :  { %v6814_v60 = vld [vmem:[%s9092_s5 + $0xf4] ss:$116 sps:$4 sm:$0xff]  }
 0x1fb   :  { %5778 = vmatmul.mubr.msk.bf16.vlgmr.msra.gmra.mxu1 %vm898_vm5, %v7420_v51  ;;  %5780 = vmatmul.mubr.msk.bf16.vlgmr.msra.gmra.mxu0 %vm898_vm5, %v7420_v51 }
 0x1fc   :  { %1409 = vmatpush1.bf16.msra.mxu1 %v964_v63  ;;  %1450 = vmatpush1.bf16.msra.mxu0 %v970_v0  ;;  %v6820_v63 = vld [vmem:[%s9092_s5 + $0xc] ss:$116 sps:$4 sm:$0xff]   ;;  %v6823_v0 = vld [vmem:[%s9092_s5 + $0x14] ss:$116 sps:$4 sm:$0xff]  }
 0x1fd   :  { %1410 = vmatprep.subr.bf16.mxu1 %v6744_v2  ;;  %1451 = vmatprep.subr.bf16.mxu0 %v6747_v3  ;;  %v6818_v2 = vld [vmem:[%s9092_s5 + $0x8] ss:$116 sps:$4 sm:$0xff]   ;;  %v6821_v3 = vld [vmem:[%s9092_s5 + $0x10] ss:$116 sps:$4 sm:$0xff]  }
 0x1fe   :  { %1432 = vmatprep.mubr.bf16.mxu1 %v7217_v43  ;;  %1473 = vmatprep.mubr.bf16.mxu0 %v7217_v43 }
 0x200   :  { %1411 = vmatpush1.bf16.msra.mxu1 %v6742_v4  ;;  %1452 = vmatpush1.bf16.msra.mxu0 %v6745_v5  ;;  %v6824_v4 = vld [vmem:[%s9092_s5 + $0x2d4] ss:$116 sps:$4 sm:$0x3f]   ;;  %v6826_v5 = vld [vmem:[%s9092_s5 + $0x2dc] ss:$116 sps:$4 sm:$0x3f]  }
 0x201   :  { %1412 = vmatprep.subr.bf16.mxu1 %v6750_v6  ;;  %1453 = vmatprep.subr.bf16.mxu0 %v6753_v7  ;;  %v6828_v6 = vld [vmem:[%s9092_s5 + $0x2d0] ss:$116 sps:$4 sm:$0x3f]   ;;  %v6829_v7 = vld [vmem:[%s9092_s5 + $0x2d8] ss:$116 sps:$4 sm:$0x3f]  }
 0x204   :  { %1413 = vmatpush1.bf16.msra.mxu1 %v6748_v8  ;;  %1454 = vmatpush1.bf16.msra.mxu0 %v6751_v9  ;;  %v2302_v8 = vsel %vm902_vm4, %v6828_v6, 0  ;;  %v2308_v9 = vsel %vm902_vm4, %v6829_v7, 0  ;;  %v6905_v6 = vld [vmem:[%s9092_s5 + $0x220] ss:$116 sps:$4 sm:$0xff]  }
 0x205   :  { %1414 = vmatprep.subr.bf16.mxu1 %v6756_v10  ;;  %1455 = vmatprep.subr.bf16.mxu0 %v6759_v11  ;;  %v6832_v10 = vld [vmem:[%s9092_s5 + $0x1ec] ss:$116 sps:$4 sm:$0xff]   ;;  %v6835_v11 = vld [vmem:[%s9092_s5 + $0x1f4] ss:$116 sps:$4 sm:$0xff]  }
 0x206   :  { %v6910_v7 = vld [vmem:[%s9092_s5 + $0x134] ss:$116 sps:$4 sm:$0xff]  }
 0x208   :  { %1415 = vmatpush1.bf16.msra.mxu1 %v6754_v12  ;;  %1456 = vmatpush1.bf16.msra.mxu0 %v6757_v13  ;;  %v6830_v12 = vld [vmem:[%s9092_s5 + $0x1e8] ss:$116 sps:$4 sm:$0xff]   ;;  %v6833_v13 = vld [vmem:[%s9092_s5 + $0x1f0] ss:$116 sps:$4 sm:$0xff]  }
 0x209   :  { %5785 = vmatprep.subr.msk.bf16.mxu1 %vm902_vm4, %v6760_v14  ;;  %5787 = vmatprep.subr.msk.bf16.mxu0 %vm902_vm4, %v6762_v15  ;;  %v6838_v14 = vld [vmem:[%s9092_s5 + $0x104] ss:$116 sps:$4 sm:$0xff]   ;;  %v6841_v15 = vld [vmem:[%s9092_s5 + $0x10c] ss:$116 sps:$4 sm:$0xff]  }
 0x20b   :  { %5782 = vmatmul.mubr.msk.bf16.vlgmr.msra.gmra.mxu1 %vm898_vm5, %v7420_v51  ;;  %5784 = vmatmul.mubr.msk.bf16.vlgmr.msra.gmra.mxu0 %vm898_vm5, %v7420_v51 }
 0x20c   :  { %1491 = vmatpush1.bf16.msra.mxu1 %v976_v18  ;;  %1532 = vmatpush1.bf16.msra.mxu0 %v982_v19  ;;  %v6844_v18 = vld [vmem:[%s9092_s5 + $0x1c] ss:$116 sps:$4 sm:$0xff]   ;;  %v6847_v19 = vld [vmem:[%s9092_s5 + $0x24] ss:$116 sps:$4 sm:$0xff]  }
 0x20d   :  { %1492 = vmatprep.subr.bf16.mxu1 %v6768_v20  ;;  %1533 = vmatprep.subr.bf16.mxu0 %v6771_v21  ;;  %v6842_v20 = vld [vmem:[%s9092_s5 + $0x18] ss:$116 sps:$4 sm:$0xff]   ;;  %v6845_v21 = vld [vmem:[%s9092_s5 + $0x20] ss:$116 sps:$4 sm:$0xff]  }
 0x20e   :  { %1514 = vmatprep.mubr.bf16.mxu1 %v7217_v43  ;;  %1555 = vmatprep.mubr.bf16.mxu0 %v7217_v43 }
 0x210   :  { %1493 = vmatpush1.bf16.msra.mxu1 %v6766_v22  ;;  %1534 = vmatpush1.bf16.msra.mxu0 %v6769_v23  ;;  %v6848_v22 = vld [vmem:[%s9092_s5 + $0x2e4] ss:$116 sps:$4 sm:$0x3f]   ;;  %v6850_v23 = vld [vmem:[%s9092_s5 + $0x2ec] ss:$116 sps:$4 sm:$0x3f]  }
 0x211   :  { %1494 = vmatprep.subr.bf16.mxu1 %v6774_v24  ;;  %1535 = vmatprep.subr.bf16.mxu0 %v6777_v25  ;;  %v6852_v24 = vld [vmem:[%s9092_s5 + $0x2e0] ss:$116 sps:$4 sm:$0x3f]   ;;  %v6853_v25 = vld [vmem:[%s9092_s5 + $0x2e8] ss:$116 sps:$4 sm:$0x3f]  }
 0x214   :  { %1495 = vmatpush1.bf16.msra.mxu1 %v6772_v26  ;;  %1536 = vmatpush1.bf16.msra.mxu0 %v6775_v27  ;;  %v2314_v26 = vsel %vm902_vm4, %v6852_v24, 0  ;;  %v2320_v27 = vsel %vm902_vm4, %v6853_v25, 0  ;;  %v6926_v25 = vld [vmem:[%s9092_s5 + $0x228] ss:$116 sps:$4 sm:$0xff]  }
 0x215   :  { %1496 = vmatprep.subr.bf16.mxu1 %v6780_v28  ;;  %1537 = vmatprep.subr.bf16.mxu0 %v6783_v29  ;;  %v6856_v28 = vld [vmem:[%s9092_s5 + $0x1fc] ss:$116 sps:$4 sm:$0xff]   ;;  %v6859_v29 = vld [vmem:[%s9092_s5 + $0x204] ss:$116 sps:$4 sm:$0xff]  }
 0x218   :  { %1497 = vmatpush1.bf16.msra.mxu1 %v6778_v30  ;;  %1538 = vmatpush1.bf16.msra.mxu0 %v6781_v31  ;;  %v6854_v30 = vld [vmem:[%s9092_s5 + $0x1f8] ss:$116 sps:$4 sm:$0xff]   ;;  %v6857_v31 = vld [vmem:[%s9092_s5 + $0x200] ss:$116 sps:$4 sm:$0xff]  }
 0x219   :  { %6556 = vmatprep.subr.bf16.mxu1 %v7215_v1  ;;  %5906 = vmatprep.subr.msk.bf16.mxu0 %vm902_vm4, %v6784_v32  ;;  %v6862_v32 = vld [vmem:[%s9092_s5 + $0x114] ss:$116 sps:$4 sm:$0xff]  }
 0x21b   :  { %5786 = vmatmul.mubr.msk.bf16.vlgmr.msra.gmra.mxu1 %vm898_vm5, %v7420_v51  ;;  %5788 = vmatmul.mubr.msk.bf16.vlgmr.msra.gmra.mxu0 %vm898_vm5, %v7420_v51 }
 0x21c   :  { %6557 = vmatpush3.bf16.msra.mxu1 %v988_v35  ;;  %2379 = vmatpush1.bf16.msra.mxu0 %v2284_v36  ;;  %v6863_v35 = vld [vmem:[%s9092_s5 + $0x118] ss:$116 sps:$4 sm:$0xff]  }
 0x21d   :  { %6558 = vmatprep.subr.bf16.mxu1 %v7215_v1  ;;  %2380 = vmatprep.subr.bf16.mxu0 %v6790_v37  ;;  %v6868_v36 = vld [vmem:[%s9092_s5 + $0x2c] ss:$116 sps:$4 sm:$0xff]   ;;  %v6871_v37 = vld [vmem:[%s9092_s5 + $0x34] ss:$116 sps:$4 sm:$0xff]  }
 0x21e   :  { %6564 = vmatprep.mubr.msk.bf16.mxu1 %vm7216_vm1, %v7215_v1  ;;  %2402 = vmatprep.mubr.bf16.mxu0 %v7217_v43 }
 0x220   :  { %6559 = vmatpush3.bf16.msra.mxu1 %v6791_v39  ;;  %2381 = vmatpush1.bf16.msra.mxu0 %v6788_v38  ;;  %v6866_v38 = vld [vmem:[%s9092_s5 + $0x28] ss:$116 sps:$4 sm:$0xff]   ;;  %v6869_v39 = vld [vmem:[%s9092_s5 + $0x30] ss:$116 sps:$4 sm:$0xff]  }
 0x221   :  { %6560 = vmatprep.subr.bf16.mxu1 %v7215_v1  ;;  %2382 = vmatprep.subr.bf16.mxu0 %v6794_v40  ;;  %v6872_v40 = vld [vmem:[%s9092_s5 + $0x2f4] ss:$116 sps:$4 sm:$0x3f]  }
 0x224   :  { %6561 = vmatpush3.bf16.msra.mxu1 %v6795_v42  ;;  %2383 = vmatpush1.bf16.msra.mxu0 %v6792_v41  ;;  %v6874_v41 = vld [vmem:[%s9092_s5 + $0x2fc] ss:$116 sps:$4 sm:$0x3f]  }
 0x225   :  { %6562 = vmatprep.subr.bf16.mxu1 %v7215_v1  ;;  %2384 = vmatprep.subr.bf16.mxu0 %v6798_v44  ;;  %v6876_v42 = vld [vmem:[%s9092_s5 + $0x2f0] ss:$116 sps:$4 sm:$0x3f]   ;;  %v6877_v44 = vld [vmem:[%s9092_s5 + $0x2f8] ss:$116 sps:$4 sm:$0x3f]  }
 0x228   :  { %6563 = vmatpush3.bf16.msra.mxu1 %v6799_v46  ;;  %2385 = vmatpush1.bf16.msra.mxu0 %v6796_v45  ;;  %v2326_v45 = vsel %vm902_vm4, %v6876_v42, 0  ;;  %v2332_v46 = vsel %vm902_vm4, %v6877_v44, 0  ;;  %v6946_v42 = vld [vmem:[%s9092_s5 + $0x320] ss:$116 sps:$4 sm:$0x3f]  }
 0x229   :  { %5908 = vmatprep.subr.msk.bf16.mxu1 %vm902_vm4, %v6800_v48  ;;  %5910 = vmatprep.subr.msk.bf16.mxu0 %vm902_vm4, %v6802_v49  ;;  %v6883_v48 = vld [vmem:[%s9092_s5 + $0x214] ss:$116 sps:$4 sm:$0xff]  }
 0x22a   :  { %v6878_v49 = vld [vmem:[%s9092_s5 + $0x208] ss:$116 sps:$4 sm:$0xff]  }
 0x22b   :  { %6565 = vmatmul.mubr.msk.bf16.vlgmr.msra.gmra.mxu1 %vm898_vm5, %v7420_v51  ;;  %5907 = vmatmul.mubr.msk.bf16.vlgmr.msra.gmra.mxu0 %vm898_vm5, %v7821_v53  ;;  %v6817_v51 = vld [vmem:[%s9092_s5 + $0xfc] ss:$116 sps:$4 sm:$0xff]  }
 0x22c   :  { %2420 = vmatpush1.bf16.msra.mxu1 %v2290_v54  ;;  %2461 = vmatpush1.bf16.msra.mxu0 %v2296_v55  ;;  %v6889_v54 = vld [vmem:[%s9092_s5 + $0x12c] ss:$116 sps:$4 sm:$0xff]   ;;  %v6947_v44 = vld [vmem:[%s9092_s5 + $0x328] ss:$116 sps:$4 sm:$0x3f]  }
 0x22d   :  { %2421 = vmatprep.subr.bf16.mxu1 %v6808_v56  ;;  %2462 = vmatprep.subr.bf16.mxu0 %v6811_v57  ;;  %v6884_v55 = vld [vmem:[%s9092_s5 + $0x120] ss:$116 sps:$4 sm:$0xff]   ;;  %v6887_v56 = vld [vmem:[%s9092_s5 + $0x128] ss:$116 sps:$4 sm:$0xff]  }
 0x22e   :  { %2443 = vmatprep.mubr.bf16.mxu1 %v7217_v43  ;;  %2484 = vmatprep.mubr.bf16.mxu0 %v7217_v43  ;;  %v6892_v57 = vld [vmem:[%s9092_s5 + $0x3c] ss:$116 sps:$4 sm:$0xff]  }
 0x230   :  { %2422 = vmatpush1.bf16.msra.mxu1 %v6806_v58  ;;  %2463 = vmatpush1.bf16.msra.mxu0 %v6809_v59  ;;  %v6895_v58 = vld [vmem:[%s9092_s5 + $0x44] ss:$116 sps:$4 sm:$0xff]  }
 0x231   :  { %2423 = vmatprep.subr.bf16.mxu1 %v6814_v60  ;;  %2464 = vmatprep.subr.bf16.mxu0 %v6817_v51  ;;  %v6890_v59 = vld [vmem:[%s9092_s5 + $0x38] ss:$116 sps:$4 sm:$0xff]   ;;  %v6893_v60 = vld [vmem:[%s9092_s5 + $0x40] ss:$116 sps:$4 sm:$0xff]  }
 0x232   :  { %v6896_v51 = vld [vmem:[%s9092_s5 + $0x304] ss:$116 sps:$4 sm:$0x3f]  }
 0x234   :  { %2424 = vmatpush1.bf16.msra.mxu1 %v6812_v61  ;;  %2465 = vmatpush1.bf16.msra.mxu0 %v6815_v62  ;;  %v6898_v61 = vld [vmem:[%s9092_s5 + $0x30c] ss:$116 sps:$4 sm:$0x3f]  }
 0x235   :  { %2425 = vmatprep.subr.bf16.mxu1 %v6820_v63  ;;  %2466 = vmatprep.subr.bf16.mxu0 %v6823_v0  ;;  %v6900_v62 = vld [vmem:[%s9092_s5 + $0x300] ss:$116 sps:$4 sm:$0x3f]   ;;  %v6901_v63 = vld [vmem:[%s9092_s5 + $0x308] ss:$116 sps:$4 sm:$0x3f]  }
 0x236   :  { %v2338_v0 = vsel %vm902_vm4, %v6900_v62, 0  ;;  %v6956_v62 = vld [vmem:[%s9092_s5 + $0x68] ss:$116 sps:$4 sm:$0xff]  }
 0x238   :  { %2426 = vmatpush1.bf16.msra.mxu1 %v6818_v2  ;;  %2467 = vmatpush1.bf16.msra.mxu0 %v6821_v3  ;;  %v2344_v2 = vsel %vm902_vm4, %v6901_v63, 0  ;;  %v6904_v3 = vld [vmem:[%s9092_s5 + $0x21c] ss:$116 sps:$4 sm:$0xff]  }
 0x239   :  { %5912 = vmatprep.subr.msk.bf16.mxu1 %vm902_vm4, %v6824_v4  ;;  %5914 = vmatprep.subr.msk.bf16.mxu0 %vm902_vm4, %v6826_v5  ;;  %v6907_v4 = vld [vmem:[%s9092_s5 + $0x224] ss:$116 sps:$4 sm:$0xff]  }
 0x23a   :  { %v6902_v5 = vld [vmem:[%s9092_s5 + $0x218] ss:$116 sps:$4 sm:$0xff]   ;;  %v6959_v63 = vld [vmem:[%s9092_s5 + $0x70] ss:$116 sps:$4 sm:$0xff]  }
 0x23b   :  { %5909 = vmatmul.mubr.msk.bf16.vlgmr.msra.gmra.mxu1 %vm898_vm5, %v7821_v53  ;;  %5911 = vmatmul.mubr.msk.bf16.vlgmr.msra.gmra.mxu0 %vm898_vm5, %v7821_v53 }
 0x23c   :  { %2502 = vmatpush1.bf16.msra.mxu1 %v2302_v8  ;;  %2543 = vmatpush1.bf16.msra.mxu0 %v2308_v9  ;;  %v6913_v8 = vld [vmem:[%s9092_s5 + $0x13c] ss:$116 sps:$4 sm:$0xff]  }
 0x23d   :  { %2503 = vmatprep.subr.bf16.mxu1 %v6832_v10  ;;  %2544 = vmatprep.subr.bf16.mxu0 %v6835_v11  ;;  %v6908_v9 = vld [vmem:[%s9092_s5 + $0x130] ss:$116 sps:$4 sm:$0xff]   ;;  %v6911_v10 = vld [vmem:[%s9092_s5 + $0x138] ss:$116 sps:$4 sm:$0xff]  }
 0x23e   :  { %2525 = vmatprep.mubr.bf16.mxu1 %v7217_v43  ;;  %2566 = vmatprep.mubr.bf16.mxu0 %v7217_v43  ;;  %v6916_v11 = vld [vmem:[%s9092_s5 + $0x4c] ss:$116 sps:$4 sm:$0xff]  }
 0x240   :  { %2504 = vmatpush1.bf16.msra.mxu1 %v6830_v12  ;;  %2545 = vmatpush1.bf16.msra.mxu0 %v6833_v13  ;;  %v6919_v12 = vld [vmem:[%s9092_s5 + $0x54] ss:$116 sps:$4 sm:$0xff]  }
 0x241   :  { %2505 = vmatprep.subr.bf16.mxu1 %v6838_v14  ;;  %2546 = vmatprep.subr.bf16.mxu0 %v6841_v15  ;;  %v6914_v13 = vld [vmem:[%s9092_s5 + $0x48] ss:$116 sps:$4 sm:$0xff]   ;;  %v6917_v14 = vld [vmem:[%s9092_s5 + $0x50] ss:$116 sps:$4 sm:$0xff]  }
 0x242   :  { %v6920_v15 = vld [vmem:[%s9092_s5 + $0x314] ss:$116 sps:$4 sm:$0x3f]  }
 0x244   :  { %2506 = vmatpush1.bf16.msra.mxu1 %v6836_v16  ;;  %2547 = vmatpush1.bf16.msra.mxu0 %v6839_v17  ;;  %v6922_v16 = vld [vmem:[%s9092_s5 + $0x31c] ss:$116 sps:$4 sm:$0x3f]  }
 0x245   :  { %2507 = vmatprep.subr.bf16.mxu1 %v6844_v18  ;;  %2548 = vmatprep.subr.bf16.mxu0 %v6847_v19  ;;  %v6924_v17 = vld [vmem:[%s9092_s5 + $0x310] ss:$116 sps:$4 sm:$0x3f]   ;;  %v6925_v18 = vld [vmem:[%s9092_s5 + $0x318] ss:$116 sps:$4 sm:$0x3f]  }
 0x246   :  { %v2350_v19 = vsel %vm902_vm4, %v6924_v17, 0  ;;  %v6979_v17 = vld [vmem:[%s9093_s6 + $0xa8] sm:$0xff]  }
 0x248   :  { %2508 = vmatpush1.bf16.msra.mxu1 %v6842_v20  ;;  %2549 = vmatpush1.bf16.msra.mxu0 %v6845_v21  ;;  %v2356_v20 = vsel %vm902_vm4, %v6925_v18, 0  ;;  %v6928_v21 = vld [vmem:[%s9092_s5 + $0x22c] ss:$116 sps:$4 sm:$0xff]  }
 0x249   :  { %5916 = vmatprep.subr.msk.bf16.mxu1 %vm902_vm4, %v6848_v22  ;;  %5918 = vmatprep.subr.msk.bf16.mxu0 %vm902_vm4, %v6850_v23  ;;  %v6931_v22 = vld [vmem:[%s9092_s5 + $0x234] ss:$116 sps:$4 sm:$0xff]  }
 0x24b   :  { %5913 = vmatmul.mubr.msk.bf16.vlgmr.msra.gmra.mxu1 %vm898_vm5, %v7821_v53  ;;  %5915 = vmatmul.mubr.msk.bf16.vlgmr.msra.gmra.mxu0 %vm898_vm5, %v7821_v53 }
 0x24c   :  { %2584 = vmatpush1.bf16.msra.mxu1 %v2314_v26  ;;  %2625 = vmatpush1.bf16.msra.mxu0 %v2320_v27  ;;  %v6929_v26 = vld [vmem:[%s9092_s5 + $0x230] ss:$116 sps:$4 sm:$0xff]  }
 0x24d   :  { %2585 = vmatprep.subr.bf16.mxu1 %v6856_v28  ;;  %2626 = vmatprep.subr.bf16.mxu0 %v6859_v29  ;;  %v6934_v29 = vld [vmem:[%s9092_s5 + $0x144] ss:$116 sps:$4 sm:$0xff]  }
 0x24e   :  { %2607 = vmatprep.mubr.bf16.mxu1 %v7217_v43  ;;  %2648 = vmatprep.mubr.bf16.mxu0 %v7217_v43 }
 0x250   :  { %2586 = vmatpush1.bf16.msra.mxu1 %v6854_v30  ;;  %2627 = vmatpush1.bf16.msra.mxu0 %v6857_v31  ;;  %v6937_v30 = vld [vmem:[%s9092_s5 + $0x14c] ss:$116 sps:$4 sm:$0xff]  }
 0x251   :  { %2587 = vmatprep.subr.bf16.mxu1 %v6862_v32  ;;  %2628 = vmatprep.subr.bf16.mxu0 %v6865_v33  ;;  %v6932_v33 = vld [vmem:[%s9092_s5 + $0x140] ss:$116 sps:$4 sm:$0xff]  }
 0x254   :  { %2588 = vmatpush1.bf16.msra.mxu1 %v6860_v34  ;;  %2629 = vmatpush1.bf16.msra.mxu0 %v6863_v35  ;;  %v6935_v34 = vld [vmem:[%s9092_s5 + $0x148] ss:$116 sps:$4 sm:$0xff]  }
 0x255   :  { %2589 = vmatprep.subr.bf16.mxu1 %v6868_v36  ;;  %2630 = vmatprep.subr.bf16.mxu0 %v6871_v37  ;;  %v6940_v37 = vld [vmem:[%s9092_s5 + $0x5c] ss:$116 sps:$4 sm:$0xff]  }
 0x258   :  { %2590 = vmatpush1.bf16.msra.mxu1 %v6866_v38  ;;  %2631 = vmatpush1.bf16.msra.mxu0 %v6869_v39  ;;  %v6943_v38 = vld [vmem:[%s9092_s5 + $0x64] ss:$116 sps:$4 sm:$0xff]  }
 0x259   :  { %5920 = vmatprep.subr.msk.bf16.mxu1 %vm902_vm4, %v6872_v40  ;;  %5922 = vmatprep.subr.msk.bf16.mxu0 %vm902_vm4, %v6874_v41  ;;  %v6938_v39 = vld [vmem:[%s9092_s5 + $0x58] ss:$116 sps:$4 sm:$0xff]   ;;  %v6941_v40 = vld [vmem:[%s9092_s5 + $0x60] ss:$116 sps:$4 sm:$0xff]  }
 0x25a   :  { %v6944_v41 = vld [vmem:[%s9092_s5 + $0x324] ss:$116 sps:$4 sm:$0x3f]  }
 0x25b   :  { %5917 = vmatmul.mubr.msk.bf16.vlgmr.msra.gmra.mxu1 %vm898_vm5, %v7821_v53  ;;  %5919 = vmatmul.mubr.msk.bf16.vlgmr.msra.gmra.mxu0 %vm898_vm5, %v7821_v53 }
 0x25c   :  { %2666 = vmatpush1.bf16.msra.mxu1 %v2326_v45  ;;  %2707 = vmatpush1.bf16.msra.mxu0 %v2332_v46  ;;  %v2362_v45 = vsel %vm902_vm4, %v6946_v42, 0  ;;  %v2368_v46 = vsel %vm902_vm4, %v6947_v44, 0 }
 0x25d   :  { %2667 = vmatprep.subr.bf16.mxu1 %v6880_v47  ;;  %2708 = vmatprep.subr.bf16.mxu0 %v6883_v48  ;;  %v6950_v47 = vld [vmem:[%s9092_s5 + $0x23c] ss:$116 sps:$4 sm:$0xff]  }
 0x25e   :  { %2689 = vmatprep.mubr.bf16.mxu1 %v7217_v43  ;;  %2730 = vmatprep.mubr.bf16.mxu0 %v7217_v43 }
 0x260   :  { %2668 = vmatpush1.bf16.msra.mxu1 %v6878_v49  ;;  %2709 = vmatpush1.bf16.msra.mxu0 %v6881_v50  ;;  %v6948_v50 = vld [vmem:[%s9092_s5 + $0x238] ss:$116 sps:$4 sm:$0xff]  }
 0x261   :  { %2669 = vmatprep.subr.bf16.mxu1 %v6886_v52  ;;  %2710 = vmatprep.subr.bf16.mxu0 %v6889_v54  ;;  %v6951_v52 = vld [vmem:[%s9092_s5 + $0x240] ss:$116 sps:$4 sm:$0xff]  }
 0x264   :  { %2670 = vmatpush1.bf16.msra.mxu1 %v6884_v55  ;;  %2711 = vmatpush1.bf16.msra.mxu0 %v6887_v56  ;;  %v6954_v56 = vld [vmem:[%s9092_s5 + $0x154] ss:$116 sps:$4 sm:$0xff]  }
 0x265   :  { %2671 = vmatprep.subr.bf16.mxu1 %v6892_v57  ;;  %2712 = vmatprep.subr.bf16.mxu0 %v6895_v58 }
 0x268   :  { %2672 = vmatpush1.bf16.msra.mxu1 %v6890_v59  ;;  %2713 = vmatpush1.bf16.msra.mxu0 %v6893_v60  ;;  %v6952_v59 = vld [vmem:[%s9092_s5 + $0x150] ss:$116 sps:$4 sm:$0xff]   ;;  %v6955_v60 = vld [vmem:[%s9092_s5 + $0x158] ss:$116 sps:$4 sm:$0xff]  }
 0x269   :  { %5924 = vmatprep.subr.msk.bf16.mxu1 %vm902_vm4, %v6896_v51  ;;  %5926 = vmatprep.subr.msk.bf16.mxu0 %vm902_vm4, %v6898_v61 }
 0x26b   :  { %5921 = vmatmul.mubr.msk.bf16.vlgmr.msra.gmra.mxu1 %vm898_vm5, %v7821_v53  ;;  %5923 = vmatmul.mubr.msk.bf16.vlgmr.msra.gmra.mxu0 %vm898_vm5, %v7821_v53 }
 0x26c   :  { %2748 = vmatpush1.bf16.msra.mxu1 %v2338_v0  ;;  %2789 = vmatpush1.bf16.msra.mxu0 %v2344_v2  ;;  %v6960_v0 = vld [vmem:[%s9093_s6 + $0x78] sm:$0xff]  }
 0x26d   :  { %2749 = vmatprep.subr.bf16.mxu1 %v6904_v3  ;;  %2790 = vmatprep.subr.bf16.mxu0 %v6907_v4  ;;  %v6969_v2 = vld [vmem:[%s9093_s6 + $0xf8] sm:$0xff]  }
 0x26e   :  { %2771 = vmatprep.mubr.bf16.mxu1 %v7217_v43  ;;  %2812 = vmatprep.mubr.bf16.mxu0 %v7217_v43  ;;  %v6961_v3 = vld [vmem:[%s9093_s6 + $0x38] sm:$0xff]  }
 0x26f   :  { %v6971_v4 = vld [vmem:[%s9093_s6 + $0xb8] sm:$0xff]  }
 0x270   :  { %2750 = vmatpush1.bf16.msra.mxu1 %v6902_v5  ;;  %2791 = vmatpush1.bf16.msra.mxu0 %v6905_v6  ;;  %v6962_v5 = vld [vmem:[%s9093_s6 + $0x70] sm:$0xff]  }
 0x271   :  { %2751 = vmatprep.subr.bf16.mxu1 %v6910_v7  ;;  %2792 = vmatprep.subr.bf16.mxu0 %v6913_v8  ;;  %v6973_v6 = vld [vmem:[%s9093_s6 + $0xf0] sm:$0xff]  }
 0x274   :  { %2752 = vmatpush1.bf16.msra.mxu1 %v6908_v9  ;;  %2793 = vmatpush1.bf16.msra.mxu0 %v6911_v10  ;;  %v6963_v9 = vld [vmem:[%s9093_s6 + $0x30] sm:$0xff]  }
 0x275   :  { %2753 = vmatprep.subr.bf16.mxu1 %v6916_v11  ;;  %2794 = vmatprep.subr.bf16.mxu0 %v6919_v12  ;;  %v6975_v10 = vld [vmem:[%s9093_s6 + $0xb0] sm:$0xff]  }
 0x278   :  { %2754 = vmatpush1.bf16.msra.mxu1 %v6914_v13  ;;  %2795 = vmatpush1.bf16.msra.mxu0 %v6917_v14  ;;  %v6964_v13 = vld [vmem:[%s9093_s6 + $0x68] sm:$0xff]  }
 0x279   :  { %5928 = vmatprep.subr.msk.bf16.mxu1 %vm902_vm4, %v6920_v15  ;;  %5930 = vmatprep.subr.msk.bf16.mxu0 %vm902_vm4, %v6922_v16  ;;  %v6965_v16 = vld [vmem:[%s9093_s6 + $0x28] sm:$0xff]  }
 0x27b   :  { %5925 = vmatmul.mubr.msk.bf16.vlgmr.msra.gmra.mxu1 %vm898_vm5, %v7821_v53  ;;  %5927 = vmatmul.mubr.msk.bf16.vlgmr.msra.gmra.mxu0 %vm898_vm5, %v7821_v53  ;;  %v8127_v23 = vpop.f32.mrf.mxu1  ;;  %v8129_v24 = vpop.f32.mrf.mxu0 }
 0x27c   :  { %2830 = vmatpush1.bf16.msra.mxu1 %v2350_v19  ;;  %2871 = vmatpush1.bf16.msra.mxu0 %v2356_v20  ;;  %v6966_v20 = vld [vmem:[%s9093_s6 + $0x60] sm:$0xff]  }
 0x27d   :  { %v8137_v27 = vpop.f32.mrf.mxu1  ;;  %v8139_v28 = vpop.f32.mrf.mxu0  ;;  %2831 = vmatprep.subr.bf16.mxu1 %v6928_v21  ;;  %2872 = vmatprep.subr.bf16.mxu0 %v6931_v22  ;;  %v6981_v21 = vld [vmem:[%s9093_s6 + $0xe0] sm:$0xff]  }
 0x27e   :  { %2853 = vmatprep.mubr.bf16.mxu1 %v7217_v43  ;;  %2894 = vmatprep.mubr.bf16.mxu0 %v7217_v43  ;;  %v6967_v22 = vld [vmem:[%s9093_s6 + $0x20] sm:$0xff]  }
 0x27f   :  { %v1028_v31 = vpop.f32.mrf.mxu1  ;;  %v1069_v32 = vpop.f32.mrf.mxu0 }
 0x280   :  { %2832 = vmatpush1.bf16.msra.mxu1 %v6926_v25  ;;  %2873 = vmatpush1.bf16.msra.mxu0 %v6929_v26  ;;  %v6983_v25 = vld [vmem:[%s9093_s6 + $0xa0] sm:$0xff]   ;;  %v6968_v26 = vld [vmem:[%s9093_s6 + $0x58] sm:$0xff]   ;;  %v6972_v32 = vld [vmem:[%s9093_s6 + $0x50] sm:$0xff]  }
 0x281   :  { %v1029_v35 = vpop.f32.mrf.mxu1  ;;  %v1070_v36 = vpop.f32.mrf.mxu0  ;;  %2833 = vmatprep.subr.bf16.mxu1 %v6934_v29  ;;  %2874 = vmatprep.subr.bf16.mxu0 %v6937_v30  ;;  %v6984_v29 = vld [vmem:[%s9093_s6 + $0xd8] sm:$0xff]  }
 0x282   :  { %v6970_v30 = vld [vmem:[%s9093_s6 + $0x18] sm:$0xff]   ;;  %v6974_v36 = vld [vmem:[%s9093_s6 + $0x10] sm:$0xff]  }
 0x283   :  { %v6986_v31 = vld [vmem:[%s9093_s6 + $0x98] sm:$0xff]  }
 0x284   :  { %2834 = vmatpush1.bf16.msra.mxu1 %v6932_v33  ;;  %2875 = vmatpush1.bf16.msra.mxu0 %v6935_v34  ;;  %v6988_v33 = vld [vmem:[%s9093_s6 + $0xd0] sm:$0xff]  }
 0x285   :  { %2835 = vmatprep.subr.bf16.mxu1 %v6940_v37  ;;  %2876 = vmatprep.subr.bf16.mxu0 %v6943_v38  ;;  %v6990_v37 = vld [vmem:[%s9093_s6 + $0x90] sm:$0xff]  }
 0x288   :  { %2836 = vmatpush1.bf16.msra.mxu1 %v6938_v39  ;;  %2877 = vmatpush1.bf16.msra.mxu0 %v6941_v40  ;;  %v6976_v40 = vld [vmem:[%s9093_s6 + $0x48] sm:$0xff]  }
 0x289   :  { %5932 = vmatprep.subr.msk.bf16.mxu1 %vm902_vm4, %v6944_v41  ;;  %6568 = vmatprep.subr.bf16.mxu0 %v7215_v1  ;;  %v6992_v41 = vld [vmem:[%s9093_s6 + $0xc8] sm:$0xff]  }
 0x28b   :  { %v8183_v48 = vpop.f32.mrf.mxu1  ;;  %v8185_v49 = vpop.f32.mrf.mxu0  ;;  %5929 = vmatmul.mubr.msk.bf16.vlgmr.msra.gmra.mxu1 %vm898_vm5, %v7821_v53  ;;  %5931 = vmatmul.mubr.msk.bf16.vlgmr.msra.gmra.mxu0 %vm898_vm5, %v7821_v53 }
 0x28c   :  { %2912 = vmatpush1.bf16.msra.mxu1 %v2362_v45  ;;  %6569 = vmatpush3.bf16.msra.mxu0 %v2368_v46  ;;  %v6978_v45 = vld [vmem:[%s9093_s6 + $0x8] sm:$0xff]  }
 0x28d   :  { %v8197_v54 = vpop.f32.mrf.mxu1  ;;  %v8199_v55 = vpop.f32.mrf.mxu0  ;;  %2913 = vmatprep.subr.bf16.mxu1 %v6950_v47  ;;  %6570 = vmatprep.subr.bf16.mxu0 %v7215_v1  ;;  %v6994_v46 = vld [vmem:[%s9093_s6 + $0x88] sm:$0xff]  }
 0x28e   :  { %2935 = vmatprep.mubr.bf16.mxu1 %v7217_v43  ;;  %6576 = vmatprep.mubr.msk.bf16.mxu0 %vm7216_vm1, %v7215_v1  ;;  %v6958_v43 = vld [vmem:[%s9092_s5 + $0x6c] ss:$116 sps:$4 sm:$0xff]  }
 0x28f   :  { %v1110_v57 = vpop.f32.mrf.mxu1  ;;  %v1151_v58 = vpop.f32.mrf.mxu0 }
 0x290   :  { %2914 = vmatpush1.bf16.msra.mxu1 %v6948_v50  ;;  %6571 = vmatpush3.bf16.msra.mxu0 %v6951_v52  ;;  %v6980_v52 = vld [vmem:[%s9093_s6 + $0x40] sm:$0xff]  }
 0x291   :  { %v1111_v51 = vpop.f32.mrf.mxu1  ;;  %v1152_v61 = vpop.f32.mrf.mxu0  ;;  %2915 = vmatprep.subr.bf16.mxu1 %v6954_v56  ;;  %6572 = vmatprep.subr.bf16.mxu0 %v7215_v1  ;;  %v6996_v56 = vld [vmem:[%s9093_s6 + $0xc0] sm:$0xff]  }
 0x292   :  { %v6982_v57 = vld [vmem:[%s9093_s6] sm:$0xff]  }
 0x293   :  { %v6998_v58 = vld [vmem:[%s9093_s6 + $0x80] sm:$0xff]  }
 0x294   :  { %2916 = vmatpush1.bf16.msra.mxu1 %v6952_v59  ;;  %6573 = vmatpush3.bf16.msra.mxu0 %v6955_v60  ;;  %v6985_v59 = vld [vmem:[%s9093_s6 + $0x178] sm:$0xff]  }
 0x295   :  { %2917 = vmatprep.subr.bf16.mxu1 %v6958_v43  ;;  %6574 = vmatprep.subr.bf16.mxu0 %v7215_v1  ;;  %v7001_v60 = vld [vmem:[%s9093_s6 + $0x1f8] sm:$0xff]  }
 0x298   :  { %2918 = vmatpush1.bf16.msra.mxu1 %v6956_v62  ;;  %6575 = vmatpush3.bf16.msra.mxu0 %v6959_v63 }
 0x299   :  { %6196 = vmatprep.subr.bf16.mxu1 %v6960_v0  ;;  %6218 = vmatprep.subr.bf16.mxu0 %v6969_v2 }
 0x29b   :  { %v8243_v7 = vpop.f32.mrf.mxu1  ;;  %v8245_v8 = vpop.f32.mrf.mxu0  ;;  %5933 = vmatmul.mubr.msk.bf16.vlgmr.msra.gmra.mxu1 %vm898_vm5, %v7821_v53  ;;  %6577 = vmatmul.mubr.msk.bf16.vlgmr.msra.gmra.mxu0 %vm898_vm5, %v7821_v53  ;;  %v6977_v53 = vld [vmem:[%s9093_s6 + $0xe8] sm:$0xff]  }
 0x29c   :  { %6197 = vmatpush3.bf16.msra.mxu1 %v6961_v3  ;;  %6219 = vmatpush3.bf16.msra.mxu0 %v6971_v4 }
 0x29d   :  { %v8257_v11 = vpop.f32.mrf.mxu1  ;;  %v8259_v12 = vpop.f32.mrf.mxu0  ;;  %6198 = vmatprep.subr.bf16.mxu1 %v6962_v5  ;;  %6220 = vmatprep.subr.bf16.mxu0 %v6973_v6 }
 0x29f   :  { %v1192_v14 = vpop.f32.mrf.mxu1  ;;  %v1233_v15 = vpop.f32.mrf.mxu0 }
 0x2a0   :  { %6199 = vmatpush3.bf16.msra.mxu1 %v6963_v9  ;;  %6221 = vmatpush3.bf16.msra.mxu0 %v6975_v10 }
 0x2a1   :  { %v1193_v18 = vpop.f32.mrf.mxu1  ;;  %v1234_v19 = vpop.f32.mrf.mxu0  ;;  %6200 = vmatprep.subr.bf16.mxu1 %v6964_v13  ;;  %6222 = vmatprep.subr.bf16.mxu0 %v6977_v53 }
 0x2a4   :  { %6201 = vmatpush3.bf16.msra.mxu1 %v6965_v16  ;;  %6223 = vmatpush3.bf16.msra.mxu0 %v6979_v17 }
 0x2a5   :  { %6202 = vmatprep.subr.bf16.mxu1 %v6966_v20  ;;  %6224 = vmatprep.subr.bf16.mxu0 %v6981_v21 }
 0x2a8   :  { %6203 = vmatpush3.bf16.msra.mxu1 %v6967_v22  ;;  %6225 = vmatpush3.bf16.msra.mxu0 %v6983_v25 }
 0x2a9   :  { %6204 = vmatprep.subr.bf16.mxu1 %v6968_v26  ;;  %6226 = vmatprep.subr.bf16.mxu0 %v6984_v29 }
 0x2ab   :  { %v8303_v34 = vpop.f32.mrf.mxu1  ;;  %v8305_v35 = vpop.f32.mrf.mxu0 }
 0x2ac   :  { %6205 = vmatpush3.bf16.msra.mxu1 %v6970_v30  ;;  %6227 = vmatpush3.bf16.msra.mxu0 %v6986_v31 }
 0x2ad   :  { %v8313_v38 = vpop.f32.mrf.mxu1  ;;  %v8315_v39 = vpop.f32.mrf.mxu0  ;;  %6206 = vmatprep.subr.bf16.mxu1 %v6972_v32  ;;  %6228 = vmatprep.subr.bf16.mxu0 %v6988_v33 }
 0x2af   :  { %v1274_v42 = vpop.f32.mrf.mxu1  ;;  %v1315_v44 = vpop.f32.mrf.mxu0 }
 0x2b0   :  { %6207 = vmatpush3.bf16.msra.mxu1 %v6974_v36  ;;  %6229 = vmatpush3.bf16.msra.mxu0 %v6990_v37  ;;  %v6989_v44 = vld [vmem:[%s9093_s6 + $0x170] sm:$0xff]  }
 0x2b1   :  { %v1275_v47 = vpop.f32.mrf.mxu1  ;;  %v1316_v50 = vpop.f32.mrf.mxu0  ;;  %6208 = vmatprep.subr.bf16.mxu1 %v6976_v40  ;;  %6230 = vmatprep.subr.bf16.mxu0 %v6992_v41  ;;  %v6987_v40 = vld [vmem:[%s9093_s6 + $0x138] sm:$0xff]  }
 0x2b2   :  { %v6997_v47 = vld [vmem:[%s9093_s6 + $0x160] sm:$0xff]  }
 0x2b4   :  { %6209 = vmatpush3.bf16.msra.mxu1 %v6978_v45  ;;  %6231 = vmatpush3.bf16.msra.mxu0 %v6994_v46  ;;  %v6995_v46 = vld [vmem:[%s9093_s6 + $0x128] sm:$0xff]  }
 0x2b5   :  { %6210 = vmatprep.subr.bf16.mxu1 %v6980_v52  ;;  %6232 = vmatprep.subr.bf16.mxu0 %v6996_v56  ;;  %v6999_v56 = vld [vmem:[%s9093_s6 + $0x120] sm:$0xff]  }
 0x2b8   :  { %6211 = vmatpush3.bf16.msra.mxu1 %v6982_v57  ;;  %6233 = vmatpush3.bf16.msra.mxu0 %v6998_v58 }
 0x2b9   :  { %6240 = vmatprep.subr.bf16.mxu1 %v6985_v59  ;;  %6262 = vmatprep.subr.bf16.mxu0 %v7001_v60  ;;  %v7000_v60 = vld [vmem:[%s9093_s6 + $0x158] sm:$0xff]  }
 0x2bb   :  { %v8347_v51 = vpop.f32.mrf.mxu1  ;;  %v8349_v61 = vpop.f32.mrf.mxu0 }
 0x2bd   :  { %v8351_v43 = vpop.f32.mrf.mxu1  ;;  %v8353_v62 = vpop.f32.mrf.mxu0 }
 0x2bf   :  { %v1356_v63 = vpop.f32.mrf.mxu1  ;;  %v1397_v0 = vpop.f32.mrf.mxu0 }
 0x2c1   :  { %v1357_v2 = vpop.f32.mrf.mxu1  ;;  %v1398_v3 = vpop.f32.mrf.mxu0 }
 0x2cb   :  { %v8355_v4 = vpop.f32.mrf.mxu1  ;;  %v8357_v5 = vpop.f32.mrf.mxu0 }
 0x2cd   :  { %v8359_v6 = vpop.f32.mrf.mxu1  ;;  %v8361_v9 = vpop.f32.mrf.mxu0 }
 0x2cf   :  { %v1438_v10 = vpop.f32.mrf.mxu1  ;;  %v1479_v13 = vpop.f32.mrf.mxu0 }
 0x2d1   :  { %v1439_v53 = vpop.f32.mrf.mxu1  ;;  %v1480_v14 = vpop.f32.mrf.mxu0 }
 0x2d2   :  { %v7003_v53 = vld [vmem:[%s9093_s6 + $0x1b8] sm:$0xff]  }
 0x2db   :  { %v8363_v15 = vpop.f32.mrf.mxu1  ;;  %v8365_v16 = vpop.f32.mrf.mxu0 }
 0x2dd   :  { %v8367_v17 = vpop.f32.mrf.mxu1  ;;  %v8369_v18 = vpop.f32.mrf.mxu0 }
 0x2df   :  { %v1520_v19 = vpop.f32.mrf.mxu1  ;;  %v1561_v20 = vpop.f32.mrf.mxu0 }
 0x2e1   :  { %v1521_v21 = vpop.f32.mrf.mxu1  ;;  %v1562_v22 = vpop.f32.mrf.mxu0 }
 0x2e2   :  { %v7006_v21 = vld [vmem:[%s9093_s6 + $0x110] sm:$0xff]  }
 0x2e3   :  { %v7007_v22 = vld [vmem:[%s9093_s6 + $0x1b0] sm:$0xff]  }
 0x2eb   :  { %v8371_v25 = vpop.f32.mrf.mxu1  ;;  %v2404_v26 = vpop.f32.mrf.mxu0 }
 0x2ec   :  { %v2984_v29 = vmul.f32 %v2404_v26, %v8127_v23  ;;  %v6991_v23 = vld [vmem:[%s9093_s6 + $0x130] sm:$0xff]   ;;  %v7008_v26 = vld [vmem:[%s9093_s6 + $0x148] sm:$0xff]  }
 0x2ed   :  { %v6566_v30 = vpop.f32.mrf.mxu1  ;;  %v2406_v31 = vpop.f32.mrf.mxu0 }
 0x2ee   :  { %v2985_v32 = vmul.f32 %v2406_v31, %v8137_v27  ;;  %v3013_v41 = vpack.c.bf16 %v2984_v29, %v2984_v29  ;;  %v6993_v27 = vld [vmem:[%s9093_s6 + $0x168] sm:$0xff]  }
 0x2ef   :  { %v1601_v33 = vpop.f32.mrf.mxu1  ;;  %v2408_v36 = vpop.f32.mrf.mxu0  ;;  %v7009_v29 = vld [vmem:[%s9093_s6 + $0x1e8] sm:$0xff]  }
 0x2f0   :  { %v3014_v37 = vpack.c.bf16 %v2985_v32, %v2985_v32  ;;  %v7010_v30 = vld [vmem:[%s9093_s6 + $0x108] sm:$0xff]   ;;  %v7012_v32 = vld [vmem:[%s9093_s6 + $0x140] sm:$0xff]  }
 0x2f1   :  { %v6567_v42 = vpop.f32.mrf.mxu1  ;;  %v2409_v45 = vpop.f32.mrf.mxu0  ;;  %v7011_v31 = vld [vmem:[%s9093_s6 + $0x1a8] sm:$0xff]   ;;  %v7013_v33 = vld [vmem:[%s9093_s6 + $0x1e0] sm:$0xff]  }
 0x2f2   :  { %4882 = vmatprep.mubr.bf16.mxu1 %v3014_v37 }
 0x2f3   :  { %4883 = vmatmul.mubr.bf16.vlgmr.msra.gmra.mxu1 %v3013_v41  ;;  %v7015_v41 = vld [vmem:[%s9093_s6 + $0x1a0] sm:$0xff]  }
 0x2f4   :  { %6241 = vmatpush3.bf16.msra.mxu1 %v6987_v40  ;;  %v7014_v40 = vld [vmem:[%s9093_s6 + $0x100] sm:$0xff]  }
 0x2f5   :  { %6242 = vmatprep.subr.bf16.mxu1 %v6989_v44 }
 0x2f8   :  { %6243 = vmatpush3.bf16.msra.mxu1 %v6991_v23  ;;  %v7016_v23 = vld [vmem:[%s9093_s6 + $0x1d8] sm:$0xff]  }
 0x2f9   :  { %6244 = vmatprep.subr.bf16.mxu1 %v6993_v27  ;;  %v7017_v27 = vld [vmem:[%s9093_s6 + $0x278] sm:$0xff]  }
 0x2fb   :  { %v2445_v50 = vpop.f32.mrf.mxu1  ;;  %v2486_v52 = vpop.f32.mrf.mxu0 }
 0x2fc   :  { %6245 = vmatpush3.bf16.msra.mxu1 %v6995_v46  ;;  %v2986_v57 = vmul.f32 %v2445_v50, %v8129_v24  ;;  %v7002_v24 = vld [vmem:[%s9093_s6 + $0x118] sm:$0xff]   ;;  %v2988_v42 = vmul.f32 %v2486_v52, %v8183_v48 }
 0x2fd   :  { %v2447_v58 = vpop.f32.mrf.mxu1  ;;  %v2488_v59 = vpop.f32.mrf.mxu0  ;;  %6246 = vmatprep.subr.bf16.mxu1 %v6997_v47  ;;  %v7018_v48 = vld [vmem:[%s9093_s6 + $0x198] sm:$0xff]  }
 0x2fe   :  { %v2987_v63 = vmul.f32 %v2447_v58, %v8139_v28  ;;  %v2989_v0 = vmul.f32 %v2488_v59, %v8197_v54  ;;  %v3015_v14 = vpack.c.bf16 %v2986_v57, %v2986_v57  ;;  %v7004_v28 = vld [vmem:[%s9093_s6 + $0x150] sm:$0xff]   ;;  %v7019_v52 = vld [vmem:[%s9093_s6 + $0x238] sm:$0xff]   ;;  %v3017_v58 = vpack.c.bf16 %v2988_v42, %v2988_v42 }
 0x2ff   :  { %v2449_v2 = vpop.f32.mrf.mxu1  ;;  %v2490_v3 = vpop.f32.mrf.mxu0  ;;  %v7005_v54 = vld [vmem:[%s9093_s6 + $0x1f0] sm:$0xff]  }
 0x300   :  { %v3016_v10 = vpack.c.bf16 %v2987_v63, %v2987_v63  ;;  %v3018_v13 = vpack.c.bf16 %v2989_v0, %v2989_v0  ;;  %6247 = vmatpush3.bf16.msra.mxu1 %v6999_v56  ;;  %v7021_v63 = vld [vmem:[%s9093_s6 + $0x270] sm:$0xff]   ;;  %v7024_v3 = vld [vmem:[%s9093_s6 + $0x1c8] sm:$0xff]  }
 0x301   :  { %v2450_v19 = vpop.f32.mrf.mxu1  ;;  %6248 = vmatprep.subr.bf16.mxu1 %v7000_v60  ;;  %v2491_v20 = vpop.f32.mrf.mxu0  ;;  %v7022_v0 = vld [vmem:[%s9093_s6 + $0x190] sm:$0xff]  }
 0x302   :  { %4922 = vmatprep.mubr.bf16.mxu0 %v3016_v10  ;;  %4962 = vmatprep.mubr.bf16.mxu1 %v3018_v13  ;;  %v7023_v2 = vld [vmem:[%s9093_s6 + $0x230] sm:$0xff]   ;;  %v7025_v10 = vld [vmem:[%s9093_s6 + $0x268] sm:$0xff]   ;;  %v7031_v20 = vld [vmem:[%s9093_s6 + $0x220] sm:$0xff]  }
 0x303   :  { %4923 = vmatmul.mubr.bf16.vlgmr.msra.gmra.mxu0 %v3015_v14  ;;  %v7026_v13 = vld [vmem:[%s9093_s6 + $0x188] sm:$0xff]   ;;  %v7029_v14 = vld [vmem:[%s9093_s6 + $0x260] sm:$0xff]  }
 0x304   :  { %6249 = vmatpush3.bf16.msra.mxu1 %v7002_v24  ;;  %6263 = vmatpush3.bf16.msra.mxu0 %v7003_v53  ;;  %v7027_v24 = vld [vmem:[%s9093_s6 + $0x228] sm:$0xff]   ;;  %v7028_v53 = vld [vmem:[%s9093_s6 + $0x1c0] sm:$0xff]  }
 0x305   :  { %6250 = vmatprep.subr.bf16.mxu1 %v7004_v28  ;;  %6264 = vmatprep.subr.bf16.mxu0 %v7005_v54  ;;  %v7030_v54 = vld [vmem:[%s9093_s6 + $0x180] sm:$0xff]  }
 0x308   :  { %6251 = vmatpush3.bf16.msra.mxu1 %v7006_v21  ;;  %6265 = vmatpush3.bf16.msra.mxu0 %v7007_v22 }
 0x309   :  { %6252 = vmatprep.subr.bf16.mxu1 %v7008_v26  ;;  %6266 = vmatprep.subr.bf16.mxu0 %v7009_v29  ;;  %v7032_v29 = vld [vmem:[%s9093_s6 + $0x258] sm:$0xff]  }
 0x30b   :  { %v2527_v36 = vpop.f32.mrf.mxu1  ;;  %v8438_v37 = vpop.f32.mrf.mxu0 }
 0x30c   :  { %6253 = vmatpush3.bf16.msra.mxu1 %v7010_v30  ;;  %6267 = vmatpush3.bf16.msra.mxu0 %v7011_v31  ;;  %v2990_v21 = vmul.f32 %v2527_v36, %v8185_v49  ;;  %v7033_v30 = vld [vmem:[%s9093_s6 + $0x2f8] sm:$0xff]  }
 0x30d   :  { %v2529_v44 = vpop.f32.mrf.mxu1  ;;  %v2570_v45 = vpop.f32.mrf.mxu0  ;;  %6254 = vmatprep.subr.bf16.mxu1 %v7012_v32  ;;  %6268 = vmatprep.subr.bf16.mxu0 %v7013_v33  ;;  %v7034_v49 = vld [vmem:[%s9093_s6 + $0x218] sm:$0xff]  }
 0x30e   :  { %v2991_v46 = vmul.f32 %v2529_v44, %v8199_v55  ;;  %v2993_v47 = vmul.f32 %v2570_v45, %v8257_v11  ;;  %v7020_v55 = vld [vmem:[%s9093_s6 + $0x1d0] sm:$0xff]   ;;  %v7035_v36 = vld [vmem:[%s9093_s6 + $0x2b8] sm:$0xff]  }
 0x30f   :  { %v2531_v50 = vpop.f32.mrf.mxu1  ;;  %v2572_v56 = vpop.f32.mrf.mxu0  ;;  %v7037_v45 = vld [vmem:[%s9093_s6 + $0x2f0] sm:$0xff]  }
 0x310   :  { %v3020_v57 = vpack.c.bf16 %v2991_v46, %v2991_v46  ;;  %6255 = vmatpush3.bf16.msra.mxu1 %v7014_v40  ;;  %6269 = vmatpush3.bf16.msra.mxu0 %v7015_v41  ;;  %v3022_v59 = vpack.c.bf16 %v2993_v47, %v2993_v47  ;;  %v3019_v40 = vpack.c.bf16 %v2990_v21, %v2990_v21  ;;  %v7040_v46 = vld [vmem:[%s9093_s6 + $0x248] sm:$0xff]   ;;  %v7054_v21 = vld [vmem:[%s9093_s6 + $0x290] sm:$0xff]  }
 0x311   :  { %6270 = vmatprep.subr.bf16.mxu0 %v7016_v23  ;;  %6284 = vmatprep.subr.bf16.mxu1 %v7017_v27  ;;  %v2532_v11 = vpop.f32.mrf.mxu1  ;;  %v2573_v60 = vpop.f32.mrf.mxu0  ;;  %v7038_v23 = vld [vmem:[%s9093_s6 + $0x210] sm:$0xff]   ;;  %v7041_v47 = vld [vmem:[%s9093_s6 + $0x2e8] sm:$0xff]  }
 0x312   :  { %5002 = vmatprep.mubr.bf16.mxu0 %v3020_v57  ;;  %v7039_v27 = vld [vmem:[%s9093_s6 + $0x2b0] sm:$0xff]   ;;  %v7042_v50 = vld [vmem:[%s9093_s6 + $0x208] sm:$0xff]   ;;  %v7044_v57 = vld [vmem:[%s9093_s6 + $0x240] sm:$0xff]   ;;  %v2992_v11 = vmul.f32 %v8438_v37, %v8243_v7 }
 0x313   :  { %4963 = vmatmul.mubr.bf16.vlgmr.msra.gmra.mxu1 %v3017_v58  ;;  %v7043_v56 = vld [vmem:[%s9093_s6 + $0x2a8] sm:$0xff]   ;;  %v7050_v7 = vld [vmem:[%s9093_s6 + $0x298] sm:$0xff]  }
 0x314   :  { %6271 = vmatpush3.bf16.msra.mxu0 %v7018_v48  ;;  %6285 = vmatpush3.bf16.msra.mxu1 %v7019_v52  ;;  %v7045_v48 = vld [vmem:[%s9093_s6 + $0x2e0] sm:$0xff]   ;;  %v7051_v37 = vld [vmem:[%s9093_s6 + $0x338] sm:$0xff]  }
 0x315   :  { %5042 = vmatprep.mubr.bf16.mxu1 %v3022_v59  ;;  %6272 = vmatprep.subr.bf16.mxu0 %v7020_v55  ;;  %v7046_v59 = vld [vmem:[%s9093_s6 + $0x200] sm:$0xff]  }
 0x316   :  { %6286 = vmatprep.subr.bf16.mxu1 %v7021_v63  ;;  %v7047_v55 = vld [vmem:[%s9093_s6 + $0x2a0] sm:$0xff]  }
 0x318   :  { %6273 = vmatpush3.bf16.msra.mxu0 %v7022_v0  ;;  %6287 = vmatpush3.bf16.msra.mxu1 %v7023_v2  ;;  %v7048_v0 = vld [vmem:[%s9093_s6 + $0x2d8] sm:$0xff]  }
 0x319   :  { %6274 = vmatprep.subr.bf16.mxu0 %v7024_v3  ;;  %6288 = vmatprep.subr.bf16.mxu1 %v7025_v10  ;;  %v7049_v2 = vld [vmem:[%s9093_s6 + $0x378] sm:$0xff]  }
 0x31b   :  { %v8491_v19 = vpop.f32.mrf.mxu1  ;;  %v8493_v28 = vpop.f32.mrf.mxu0 }
 0x31c   :  { %6275 = vmatpush3.bf16.msra.mxu0 %v7026_v13  ;;  %6289 = vmatpush3.bf16.msra.mxu1 %v7027_v24  ;;  %v3021_v24 = vpack.c.bf16 %v2992_v11, %v2992_v11  ;;  %v7071_v11 = vld [vmem:[%s9093_s6 + $0x3b0] sm:$0xff]  }
 0x31d   :  { %v2611_v22 = vpop.f32.mrf.mxu1  ;;  %v2652_v26 = vpop.f32.mrf.mxu0  ;;  %6276 = vmatprep.subr.bf16.mxu0 %v7028_v53  ;;  %6290 = vmatprep.subr.bf16.mxu1 %v7029_v14  ;;  %v7052_v53 = vld [vmem:[%s9093_s6 + $0x2d0] sm:$0xff]  }
 0x31e   :  { %v2995_v31 = vmul.f32 %v2611_v22, %v8259_v12  ;;  %v7036_v12 = vld [vmem:[%s9093_s6 + $0x250] sm:$0xff]   ;;  %v2997_v3 = vmul.f32 %v2652_v26, %v8313_v38  ;;  %v7056_v26 = vld [vmem:[%s9093_s6 + $0x2c8] sm:$0xff]  }
 0x31f   :  { %v2613_v32 = vpop.f32.mrf.mxu1  ;;  %v2654_v33 = vpop.f32.mrf.mxu0  ;;  %v7055_v22 = vld [vmem:[%s9093_s6 + $0x330] sm:$0xff]  }
 0x320   :  { %6277 = vmatpush3.bf16.msra.mxu0 %v7030_v54  ;;  %6291 = vmatpush3.bf16.msra.mxu1 %v7031_v20  ;;  %v3024_v41 = vpack.c.bf16 %v2995_v31, %v2995_v31  ;;  %v7053_v54 = vld [vmem:[%s9093_s6 + $0x370] sm:$0xff]   ;;  %v3026_v20 = vpack.c.bf16 %v2997_v3, %v2997_v3  ;;  %v7059_v31 = vld [vmem:[%s9093_s6 + $0x328] sm:$0xff]   ;;  %v7060_v32 = vld [vmem:[%s9093_s6 + $0x2c0] sm:$0xff]  }
 0x321   :  { %6292 = vmatprep.subr.bf16.mxu1 %v7032_v29  ;;  %6306 = vmatprep.subr.bf16.mxu0 %v7033_v30  ;;  %v2614_v42 = vpop.f32.mrf.mxu1  ;;  %v2655_v44 = vpop.f32.mrf.mxu0  ;;  %v7057_v29 = vld [vmem:[%s9093_s6 + $0x368] sm:$0xff]   ;;  %v7061_v33 = vld [vmem:[%s9093_s6 + $0x360] sm:$0xff]  }
 0x322   :  { %v7058_v30 = vld [vmem:[%s9093_s6 + $0x288] sm:$0xff]  }
 0x323   :  { %5003 = vmatmul.mubr.bf16.vlgmr.msra.gmra.mxu0 %v3019_v40  ;;  %v7062_v40 = vld [vmem:[%s9093_s6 + $0x280] sm:$0xff]   ;;  %v7075_v3 = vld [vmem:[%s9093_s6 + $0x3a8] sm:$0xff]  }
 0x324   :  { %6293 = vmatpush3.bf16.msra.mxu1 %v7034_v49  ;;  %6307 = vmatpush3.bf16.msra.mxu0 %v7035_v36 }
 0x325   :  { %5082 = vmatprep.mubr.bf16.mxu0 %v3024_v41  ;;  %6294 = vmatprep.subr.bf16.mxu1 %v7036_v12  ;;  %v7063_v41 = vld [vmem:[%s9093_s6 + $0x320] sm:$0xff]   ;;  %v2994_v12 = vmul.f32 %v8491_v19, %v8245_v8  ;;  %v7066_v8 = vld [vmem:[%s9093_s6 + $0x318] sm:$0xff]  }
 0x326   :  { %6308 = vmatprep.subr.bf16.mxu0 %v7037_v45  ;;  %v7064_v45 = vld [vmem:[%s9093_s6 + $0x358] sm:$0xff]  }
 0x327   :  { %v7067_v19 = vld [vmem:[%s9093_s6 + $0x3b8] sm:$0xff]  }
 0x328   :  { %6295 = vmatpush3.bf16.msra.mxu1 %v7038_v23  ;;  %6309 = vmatpush3.bf16.msra.mxu0 %v7039_v27  ;;  %v7065_v23 = vld [vmem:[%s9093_s6 + $0x3f8] sm:$0xff]  }
 0x329   :  { %6296 = vmatprep.subr.bf16.mxu1 %v7040_v46  ;;  %6310 = vmatprep.subr.bf16.mxu0 %v7041_v47 }
 0x32b   :  { %v8545_v52 = vpop.f32.mrf.mxu1  ;;  %v8547_v58 = vpop.f32.mrf.mxu0 }
 0x32c   :  { %6297 = vmatpush3.bf16.msra.mxu1 %v7042_v50  ;;  %6311 = vmatpush3.bf16.msra.mxu0 %v7043_v56  ;;  %v3023_v50 = vpack.c.bf16 %v2994_v12, %v2994_v12  ;;  %v7068_v56 = vld [vmem:[%s9093_s6 + $0x350] sm:$0xff]   ;;  %v7088_v12 = vld [vmem:[%s9093_s6 + $0x3c8] sm:$0xff]  }
 0x32d   :  { %v2693_v60 = vpop.f32.mrf.mxu1  ;;  %v8557_v63 = vpop.f32.mrf.mxu0  ;;  %6298 = vmatprep.subr.bf16.mxu1 %v7044_v57  ;;  %6312 = vmatprep.subr.bf16.mxu0 %v7045_v48  ;;  %v7069_v48 = vld [vmem:[%s9093_s6 + $0x3f0] sm:$0xff]  }
 0x32e   :  { %v2999_v27 = vmul.f32 %v2693_v60, %v8315_v39  ;;  %v7072_v60 = vld [vmem:[%s9093_s6 + $0x348] sm:$0xff]  }
 0x32f   :  { %v2695_v10 = vpop.f32.mrf.mxu1  ;;  %v2736_v13 = vpop.f32.mrf.mxu0 }
 0x330   :  { %6299 = vmatpush3.bf16.msra.mxu1 %v7046_v59  ;;  %6313 = vmatpush3.bf16.msra.mxu0 %v7047_v55  ;;  %v3028_v59 = vpack.c.bf16 %v2999_v27, %v2999_v27  ;;  %v7070_v55 = vld [vmem:[%s9093_s6 + $0x310] sm:$0xff]   ;;  %v7076_v10 = vld [vmem:[%s9093_s6 + $0x340] sm:$0xff]   ;;  %v7091_v27 = vld [vmem:[%s9093_s6 + $0x428] sm:$0xff]  }
 0x331   :  { %6314 = vmatprep.subr.bf16.mxu0 %v7048_v0  ;;  %6328 = vmatprep.subr.bf16.mxu1 %v7049_v2  ;;  %v2696_v38 = vpop.f32.mrf.mxu1  ;;  %v2737_v14 = vpop.f32.mrf.mxu0  ;;  %v7073_v0 = vld [vmem:[%s9093_s6 + $0x3e8] sm:$0xff]   ;;  %v7077_v13 = vld [vmem:[%s9093_s6 + $0x3e0] sm:$0xff]  }
 0x332   :  { %v7074_v2 = vld [vmem:[%s9093_s6 + $0x308] sm:$0xff]   ;;  %v2996_v38 = vmul.f32 %v8493_v28, %v8303_v34  ;;  %v7082_v34 = vld [vmem:[%s9093_s6 + $0x398] sm:$0xff]  }
 0x333   :  { %5043 = vmatmul.mubr.bf16.vlgmr.msra.gmra.mxu1 %v3021_v24  ;;  %v7078_v24 = vld [vmem:[%s9093_s6 + $0x300] sm:$0xff]   ;;  %v7083_v28 = vld [vmem:[%s9093_s6 + $0x438] sm:$0xff]  }
 0x334   :  { %6315 = vmatpush3.bf16.msra.mxu0 %v7050_v7  ;;  %6329 = vmatpush3.bf16.msra.mxu1 %v7051_v37 }
 0x335   :  { %5122 = vmatprep.mubr.bf16.mxu1 %v3026_v20  ;;  %6316 = vmatprep.subr.bf16.mxu0 %v7052_v53  ;;  %v7079_v53 = vld [vmem:[%s9093_s6 + $0x3a0] sm:$0xff]   ;;  %v7080_v20 = vld [vmem:[%s9093_s6 + $0x3d8] sm:$0xff]  }
 0x336   :  { %6330 = vmatprep.subr.bf16.mxu1 %v7053_v54 }
 0x338   :  { %6317 = vmatpush3.bf16.msra.mxu0 %v7054_v21  ;;  %6331 = vmatpush3.bf16.msra.mxu1 %v7055_v22  ;;  %v7081_v21 = vld [vmem:[%s9093_s6 + $0x478] sm:$0xff]   ;;  %v3001_v22 = vmul.f32 %v8557_v63, %v8351_v43 }
 0x339   :  { %6318 = vmatprep.subr.bf16.mxu0 %v7056_v26  ;;  %6332 = vmatprep.subr.bf16.mxu1 %v7057_v29 }
 0x33b   :  { %v8602_v49 = vpop.f32.mrf.mxu1  ;;  %v8604_v36 = vpop.f32.mrf.mxu0 }
 0x33c   :  { %6319 = vmatpush3.bf16.msra.mxu0 %v7058_v30  ;;  %6333 = vmatpush3.bf16.msra.mxu1 %v7059_v31  ;;  %v3025_v30 = vpack.c.bf16 %v2996_v38, %v2996_v38  ;;  %v7084_v31 = vld [vmem:[%s9093_s6 + $0x3d0] sm:$0xff]   ;;  %v7104_v38 = vld [vmem:[%s9093_s6 + $0x448] sm:$0xff]  }
 0x33d   :  { %v8614_v42 = vpop.f32.mrf.mxu1  ;;  %v8616_v44 = vpop.f32.mrf.mxu0  ;;  %6320 = vmatprep.subr.bf16.mxu0 %v7060_v32  ;;  %6334 = vmatprep.subr.bf16.mxu1 %v7061_v33  ;;  %v7085_v32 = vld [vmem:[%s9093_s6 + $0x470] sm:$0xff]   ;;  %v3030_v33 = vpack.c.bf16 %v3001_v22, %v3001_v22  ;;  %v7107_v22 = vld [vmem:[%s9093_s6 + $0x4a8] sm:$0xff]  }
 0x33f   :  { %v2777_v46 = vpop.f32.mrf.mxu1  ;;  %v2818_v47 = vpop.f32.mrf.mxu0 }
 0x340   :  { %6321 = vmatpush3.bf16.msra.mxu0 %v7062_v40  ;;  %6335 = vmatpush3.bf16.msra.mxu1 %v7063_v41  ;;  %v7086_v40 = vld [vmem:[%s9093_s6 + $0x390] sm:$0xff]   ;;  %v7092_v46 = vld [vmem:[%s9093_s6 + $0x3c0] sm:$0xff]  }
 0x341   :  { %6336 = vmatprep.subr.bf16.mxu1 %v7064_v45  ;;  %6350 = vmatprep.subr.bf16.mxu0 %v7065_v23  ;;  %v2778_v39 = vpop.f32.mrf.mxu1  ;;  %v2819_v57 = vpop.f32.mrf.mxu0  ;;  %v7087_v41 = vld [vmem:[%s9093_s6 + $0x430] sm:$0xff]   ;;  %v7089_v45 = vld [vmem:[%s9093_s6 + $0x468] sm:$0xff]   ;;  %v7093_v47 = vld [vmem:[%s9093_s6 + $0x460] sm:$0xff]  }
 0x342   :  { %v7090_v23 = vld [vmem:[%s9093_s6 + $0x388] sm:$0xff]   ;;  %v2998_v39 = vmul.f32 %v8545_v52, %v8305_v35  ;;  %v7098_v35 = vld [vmem:[%s9093_s6 + $0x418] sm:$0xff]  }
 0x343   :  { %5083 = vmatmul.mubr.bf16.vlgmr.msra.gmra.mxu0 %v3023_v50  ;;  %v7094_v50 = vld [vmem:[%s9093_s6 + $0x380] sm:$0xff]   ;;  %v7099_v52 = vld [vmem:[%s9093_s6 + $0x4b8] sm:$0xff]  }
 0x344   :  { %6337 = vmatpush3.bf16.msra.mxu1 %v7066_v8  ;;  %6351 = vmatpush3.bf16.msra.mxu0 %v7067_v19 }
 0x345   :  { %5162 = vmatprep.mubr.bf16.mxu0 %v3028_v59  ;;  %6338 = vmatprep.subr.bf16.mxu1 %v7068_v56  ;;  %v7095_v56 = vld [vmem:[%s9093_s6 + $0x420] sm:$0xff]   ;;  %v7097_v59 = vld [vmem:[%s9093_s6 + $0x4f8] sm:$0xff]  }
 0x346   :  { %6352 = vmatprep.subr.bf16.mxu0 %v7069_v48  ;;  %v7096_v48 = vld [vmem:[%s9093_s6 + $0x458] sm:$0xff]  }
 0x348   :  { %6339 = vmatpush3.bf16.msra.mxu1 %v7070_v55  ;;  %6353 = vmatpush3.bf16.msra.mxu0 %v7071_v11  ;;  %v3003_v11 = vmul.f32 %v8614_v42, %v8353_v62 }
 0x349   :  { %6340 = vmatprep.subr.bf16.mxu1 %v7072_v60  ;;  %6354 = vmatprep.subr.bf16.mxu0 %v7073_v0 }
 0x34b   :  { %v8661_v7 = vpop.f32.mrf.mxu1  ;;  %v8663_v37 = vpop.f32.mrf.mxu0 }
 0x34c   :  { %6341 = vmatpush3.bf16.msra.mxu1 %v7074_v2  ;;  %6355 = vmatpush3.bf16.msra.mxu0 %v7075_v3  ;;  %v3027_v2 = vpack.c.bf16 %v2998_v39, %v2998_v39  ;;  %v7100_v3 = vld [vmem:[%s9093_s6 + $0x450] sm:$0xff]   ;;  %v3002_v39 = vmul.f32 %v8602_v49, %v8349_v61  ;;  %v7131_v61 = vld [vmem:[%s9093_s6 + $0x5b8] sm:$0xff]  }
 0x34d   :  { %v8673_v14 = vpop.f32.mrf.mxu1  ;;  %v8675_v54 = vpop.f32.mrf.mxu0  ;;  %6342 = vmatprep.subr.bf16.mxu1 %v7076_v10  ;;  %6356 = vmatprep.subr.bf16.mxu0 %v7077_v13  ;;  %v7101_v10 = vld [vmem:[%s9093_s6 + $0x4f0] sm:$0xff]   ;;  %v3032_v13 = vpack.c.bf16 %v3003_v11, %v3003_v11  ;;  %v7130_v11 = vld [vmem:[%s9093_s6 + $0x518] sm:$0xff]  }
 0x34e   :  { %v3031_v49 = vpack.c.bf16 %v3002_v39, %v3002_v39  ;;  %v7173_v39 = vld [vmem:[%s9093_s6 + $0x6e0] sm:$0xff]  }
 0x34f   :  { %v2859_v26 = vpop.f32.mrf.mxu1  ;;  %v2900_v29 = vpop.f32.mrf.mxu0 }
 0x350   :  { %6343 = vmatpush3.bf16.msra.mxu1 %v7078_v24  ;;  %6357 = vmatpush3.bf16.msra.mxu0 %v7079_v53  ;;  %v7102_v24 = vld [vmem:[%s9093_s6 + $0x410] sm:$0xff]   ;;  %v7108_v26 = vld [vmem:[%s9093_s6 + $0x440] sm:$0xff]  }
 0x351   :  { %6358 = vmatprep.subr.bf16.mxu0 %v7080_v20  ;;  %6372 = vmatprep.subr.bf16.mxu1 %v7081_v21  ;;  %v2860_v43 = vpop.f32.mrf.mxu1  ;;  %v2901_v63 = vpop.f32.mrf.mxu0  ;;  %v7103_v53 = vld [vmem:[%s9093_s6 + $0x4b0] sm:$0xff]   ;;  %v7105_v20 = vld [vmem:[%s9093_s6 + $0x4e8] sm:$0xff]   ;;  %v7109_v29 = vld [vmem:[%s9093_s6 + $0x4e0] sm:$0xff]  }
 0x352   :  { %v7106_v21 = vld [vmem:[%s9093_s6 + $0x408] sm:$0xff]   ;;  %v7113_v43 = vld [vmem:[%s9093_s6 + $0x578] sm:$0xff]   ;;  %v3005_v63 = vmul.f32 %v8616_v44, %v8359_v6  ;;  %v7117_v6 = vld [vmem:[%s9093_s6 + $0x570] sm:$0xff]  }
 0x353   :  { %5123 = vmatmul.mubr.bf16.vlgmr.msra.gmra.mxu1 %v3025_v30  ;;  %v3000_v30 = vmul.f32 %v8547_v58, %v8347_v51  ;;  %v7115_v51 = vld [vmem:[%s9093_s6 + $0x538] sm:$0xff]  }
 0x354   :  { %6359 = vmatpush3.bf16.msra.mxu0 %v7082_v34  ;;  %6373 = vmatpush3.bf16.msra.mxu1 %v7083_v28  ;;  %v7110_v34 = vld [vmem:[%s9093_s6 + $0x400] sm:$0xff]   ;;  %v3034_v44 = vpack.c.bf16 %v3005_v63, %v3005_v63 }
 0x355   :  { %5202 = vmatprep.mubr.bf16.mxu1 %v3030_v33  ;;  %6360 = vmatprep.subr.bf16.mxu0 %v7084_v31  ;;  %v7111_v28 = vld [vmem:[%s9093_s6 + $0x4a0] sm:$0xff]   ;;  %v7112_v31 = vld [vmem:[%s9093_s6 + $0x4d8] sm:$0xff]   ;;  %v3029_v58 = vpack.c.bf16 %v3000_v30, %v3000_v30  ;;  %v7116_v33 = vld [vmem:[%s9093_s6 + $0x4d0] sm:$0xff]  }
 0x356   :  { %6374 = vmatprep.subr.bf16.mxu1 %v7085_v32  ;;  %v7114_v32 = vld [vmem:[%s9093_s6 + $0x498] sm:$0xff]   ;;  %v7153_v30 = vld [vmem:[%s9093_s6 + $0x668] sm:$0xff]   ;;  %v7156_v63 = vld [vmem:[%s9093_s6 + $0x5c0] sm:$0xff]  }
 0x358   :  { %6361 = vmatpush3.bf16.msra.mxu0 %v7086_v40  ;;  %6375 = vmatpush3.bf16.msra.mxu1 %v7087_v41  ;;  %v7118_v40 = vld [vmem:[%s9093_s6 + $0x490] sm:$0xff]  }
 0x359   :  { %6362 = vmatprep.subr.bf16.mxu0 %v7088_v12  ;;  %6376 = vmatprep.subr.bf16.mxu1 %v7089_v45  ;;  %v7119_v41 = vld [vmem:[%s9093_s6 + $0x530] sm:$0xff]   ;;  %v7120_v12 = vld [vmem:[%s9093_s6 + $0x4c8] sm:$0xff]  }
 0x35a   :  { %v7121_v45 = vld [vmem:[%s9093_s6 + $0x568] sm:$0xff]  }
 0x35b   :  { %v8721_v8 = vpop.f32.mrf.mxu1  ;;  %v8723_v19 = vpop.f32.mrf.mxu0 }
 0x35c   :  { %6363 = vmatpush3.bf16.msra.mxu0 %v7090_v23  ;;  %6377 = vmatpush3.bf16.msra.mxu1 %v7091_v27  ;;  %v7122_v23 = vld [vmem:[%s9093_s6 + $0x488] sm:$0xff]  }
 0x35d   :  { %v8733_v57 = vpop.f32.mrf.mxu1  ;;  %6364 = vmatprep.subr.bf16.mxu0 %v7092_v46  ;;  %6378 = vmatprep.subr.bf16.mxu1 %v7093_v47  ;;  %v6578_v55 = vpop.f32.mrf.mxu0  ;;  %v7123_v27 = vld [vmem:[%s9093_s6 + $0x528] sm:$0xff]   ;;  %v7124_v46 = vld [vmem:[%s9093_s6 + $0x4c0] sm:$0xff]  }
 0x35e   :  { %v7125_v47 = vld [vmem:[%s9093_s6 + $0x560] sm:$0xff]   ;;  %v3007_v55 = vmul.f32 %v8673_v14, %v8361_v9  ;;  %v7133_v9 = vld [vmem:[%s9093_s6 + $0x5f0] sm:$0xff]  }
 0x35f   :  { %v2941_v60 = vpop.f32.mrf.mxu1  ;;  %v2981_v0 = vpop.f32.mrf.mxu0 }
 0x360   :  { %6365 = vmatpush3.bf16.msra.mxu0 %v7094_v50  ;;  %6379 = vmatpush3.bf16.msra.mxu1 %v7095_v56  ;;  %v7126_v50 = vld [vmem:[%s9093_s6 + $0x480] sm:$0xff]   ;;  %v7132_v60 = vld [vmem:[%s9093_s6 + $0x550] sm:$0xff]   ;;  %v3036_v14 = vpack.c.bf16 %v3007_v55, %v3007_v55  ;;  %v3008_v55 = vmul.f32 %v8663_v37, %v8363_v15 }
 0x361   :  { %6380 = vmatprep.subr.bf16.mxu1 %v7096_v48  ;;  %6394 = vmatprep.subr.bf16.mxu0 %v7097_v59  ;;  %v2942_v62 = vpop.f32.mrf.mxu1  ;;  %v6579_v42 = vpop.f32.mrf.mxu0  ;;  %v7127_v56 = vld [vmem:[%s9093_s6 + $0x520] sm:$0xff]   ;;  %v7128_v48 = vld [vmem:[%s9093_s6 + $0x558] sm:$0xff]   ;;  %v7134_v0 = vld [vmem:[%s9093_s6 + $0x510] sm:$0xff]  }
 0x362   :  { %v7129_v59 = vld [vmem:[%s9093_s6 + $0x5f8] sm:$0xff]   ;;  %v7139_v62 = vld [vmem:[%s9093_s6 + $0x5a8] sm:$0xff]   ;;  %v7140_v42 = vld [vmem:[%s9093_s6 + $0x540] sm:$0xff]  }
 0x363   :  { %5163 = vmatmul.mubr.bf16.vlgmr.msra.gmra.mxu0 %v3027_v2  ;;  %v7137_v2 = vld [vmem:[%s9093_s6 + $0x5e8] sm:$0xff]   ;;  %v7178_v15 = vld [vmem:[%s9093_s6 + $0x6d0] sm:$0xff]  }
 0x364   :  { %6381 = vmatpush3.bf16.msra.mxu1 %v7098_v35  ;;  %6395 = vmatpush3.bf16.msra.mxu0 %v7099_v52  ;;  %v7135_v35 = vld [vmem:[%s9093_s6 + $0x5b0] sm:$0xff]   ;;  %v7136_v52 = vld [vmem:[%s9093_s6 + $0x548] sm:$0xff]  }
 0x365   :  { %5242 = vmatprep.mubr.bf16.mxu0 %v3032_v13  ;;  %6382 = vmatprep.subr.bf16.mxu1 %v7100_v3  ;;  %v7138_v3 = vld [vmem:[%s9093_s6 + $0x508] sm:$0xff]   ;;  %v7142_v13 = vld [vmem:[%s9093_s6 + $0x500] sm:$0xff]  }
 0x366   :  { %6396 = vmatprep.subr.bf16.mxu0 %v7101_v10  ;;  %v7141_v10 = vld [vmem:[%s9093_s6 + $0x5e0] sm:$0xff]  }
 0x368   :  { %6383 = vmatpush3.bf16.msra.mxu1 %v7102_v24  ;;  %6397 = vmatpush3.bf16.msra.mxu0 %v7103_v53  ;;  %v7143_v24 = vld [vmem:[%s9093_s6 + $0x5a0] sm:$0xff]   ;;  %v3004_v53 = vmul.f32 %v8604_v36, %v8355_v4  ;;  %v7147_v4 = vld [vmem:[%s9093_s6 + $0x638] sm:$0xff]  }
 0x369   :  { %6384 = vmatprep.subr.bf16.mxu1 %v7104_v38  ;;  %6398 = vmatprep.subr.bf16.mxu0 %v7105_v20  ;;  %v7144_v38 = vld [vmem:[%s9093_s6 + $0x5d8] sm:$0xff]  }
 0x36a   :  { %v7145_v20 = vld [vmem:[%s9093_s6 + $0x678] sm:$0xff]   ;;  %v3033_v36 = vpack.c.bf16 %v3004_v53, %v3004_v53 }
 0x36c   :  { %6385 = vmatpush3.bf16.msra.mxu1 %v7106_v21  ;;  %6399 = vmatpush3.bf16.msra.mxu0 %v7107_v22  ;;  %v3009_v21 = vmul.f32 %v8675_v54, %v8367_v17  ;;  %v7146_v22 = vld [vmem:[%s9093_s6 + $0x598] sm:$0xff]   ;;  %v7149_v17 = vld [vmem:[%s9093_s6 + $0x670] sm:$0xff]  }
 0x36d   :  { %6386 = vmatprep.subr.bf16.mxu1 %v7108_v26  ;;  %6400 = vmatprep.subr.bf16.mxu0 %v7109_v29  ;;  %v7148_v26 = vld [vmem:[%s9093_s6 + $0x5d0] sm:$0xff]  }
 0x36e   :  { %v3038_v54 = vpack.c.bf16 %v3009_v21, %v3009_v21  ;;  %v7150_v29 = vld [vmem:[%s9093_s6 + $0x590] sm:$0xff]  }
 0x370   :  { %6387 = vmatpush3.bf16.msra.mxu1 %v7110_v34  ;;  %6401 = vmatpush3.bf16.msra.mxu0 %v7111_v28  ;;  %v7151_v34 = vld [vmem:[%s9093_s6 + $0x630] sm:$0xff]   ;;  %v7152_v28 = vld [vmem:[%s9093_s6 + $0x5c8] sm:$0xff]  }
 0x371   :  { %6402 = vmatprep.subr.bf16.mxu0 %v7112_v31  ;;  %6416 = vmatprep.subr.bf16.mxu1 %v7113_v43  ;;  %v7154_v31 = vld [vmem:[%s9093_s6 + $0x588] sm:$0xff]  }
 0x372   :  { %v7155_v43 = vld [vmem:[%s9093_s6 + $0x628] sm:$0xff]  }
 0x373   :  { %5203 = vmatmul.mubr.bf16.vlgmr.msra.gmra.mxu1 %v3029_v58  ;;  %v7159_v58 = vld [vmem:[%s9093_s6 + $0x620] sm:$0xff]  }
 0x374   :  { %6403 = vmatpush3.bf16.msra.mxu0 %v7114_v32  ;;  %6417 = vmatpush3.bf16.msra.mxu1 %v7115_v51  ;;  %v7157_v32 = vld [vmem:[%s9093_s6 + $0x660] sm:$0xff]  }
 0x375   :  { %5282 = vmatprep.mubr.bf16.mxu1 %v3034_v44  ;;  %6404 = vmatprep.subr.bf16.mxu0 %v7116_v33  ;;  %v7158_v51 = vld [vmem:[%s9093_s6 + $0x580] sm:$0xff]   ;;  %v3006_v33 = vmul.f32 %v8661_v7, %v8357_v5  ;;  %v7161_v44 = vld [vmem:[%s9093_s6 + $0x6f8] sm:$0xff]  }
 0x376   :  { %6418 = vmatprep.subr.bf16.mxu1 %v7117_v6  ;;  %v7160_v6 = vld [vmem:[%s9093_s6 + $0x658] sm:$0xff]  }
 0x377   :  { %v7163_v5 = vld [vmem:[%s9093_s6 + $0x6b8] sm:$0xff]   ;;  %v3035_v7 = vpack.c.bf16 %v3006_v33, %v3006_v33 }
 0x378   :  { %6405 = vmatpush3.bf16.msra.mxu0 %v7118_v40  ;;  %6419 = vmatpush3.bf16.msra.mxu1 %v7119_v41  ;;  %v3011_v40 = vmul.f32 %v8733_v57, %v8369_v18  ;;  %v7162_v41 = vld [vmem:[%s9093_s6 + $0x618] sm:$0xff]   ;;  %v7165_v18 = vld [vmem:[%s9093_s6 + $0x6f0] sm:$0xff]  }
 0x379   :  { %6406 = vmatprep.subr.bf16.mxu0 %v7120_v12  ;;  %6420 = vmatprep.subr.bf16.mxu1 %v7121_v45  ;;  %v7164_v12 = vld [vmem:[%s9093_s6 + $0x650] sm:$0xff]  }
 0x37a   :  { %v3040_v57 = vpack.c.bf16 %v3011_v40, %v3011_v40  ;;  %v7166_v45 = vld [vmem:[%s9093_s6 + $0x610] sm:$0xff]   ;;  %v5457_v40 = vld [vmem:[%s9094_s7 + $0x38] sm:$0xf] }
 0x37c   :  { %6407 = vmatpush3.bf16.msra.mxu0 %v7122_v23  ;;  %6421 = vmatpush3.bf16.msra.mxu1 %v7123_v27  ;;  %v7167_v23 = vld [vmem:[%s9093_s6 + $0x6b0] sm:$0xff]   ;;  %v7168_v27 = vld [vmem:[%s9093_s6 + $0x648] sm:$0xff]  }
 0x37d   :  { %6408 = vmatprep.subr.bf16.mxu0 %v7124_v46  ;;  %6422 = vmatprep.subr.bf16.mxu1 %v7125_v47  ;;  %v7169_v46 = vld [vmem:[%s9093_s6 + $0x6e8] sm:$0xff]  }
 0x37e   :  { %v7170_v47 = vld [vmem:[%s9093_s6 + $0x608] sm:$0xff]  }
 0x380   :  { %6409 = vmatpush3.bf16.msra.mxu0 %v7126_v50  ;;  %6423 = vmatpush3.bf16.msra.mxu1 %v7127_v56  ;;  %v7171_v50 = vld [vmem:[%s9093_s6 + $0x6a8] sm:$0xff]   ;;  %v7172_v56 = vld [vmem:[%s9093_s6 + $0x640] sm:$0xff]  }
 0x381   :  { %6424 = vmatprep.subr.bf16.mxu1 %v7128_v48  ;;  %6438 = vmatprep.subr.bf16.mxu0 %v7129_v59  ;;  %v7174_v48 = vld [vmem:[%s9093_s6 + $0x600] sm:$0xff]  }
 0x382   :  { %v7175_v59 = vld [vmem:[%s9093_s6 + $0x6a0] sm:$0xff]  }
 0x383   :  { %5243 = vmatmul.mubr.bf16.vlgmr.msra.gmra.mxu0 %v3031_v49  ;;  %v7180_v49 = vld [vmem:[%s9093_s6 + $0x700] sm:$0xff]  }
 0x384   :  { %6425 = vmatpush3.bf16.msra.mxu1 %v7130_v11  ;;  %6439 = vmatpush3.bf16.msra.mxu0 %v7131_v61  ;;  %v7176_v11 = vld [vmem:[%s9093_s6 + $0x6d8] sm:$0xff]  }
 0x385   :  { %5322 = vmatprep.mubr.bf16.mxu0 %v3036_v14  ;;  %6426 = vmatprep.subr.bf16.mxu1 %v7132_v60  ;;  %v7177_v61 = vld [vmem:[%s9093_s6 + $0x698] sm:$0xff]   ;;  %v3037_v60 = vpack.c.bf16 %v3008_v55, %v3008_v55  ;;  %v3012_v14 = vmul.f32 %v8723_v19, %v8371_v25 }
 0x386   :  { %6440 = vmatprep.subr.bf16.mxu0 %v7133_v9  ;;  %v7179_v9 = vld [vmem:[%s9093_s6 + $0x690] sm:$0xff]  }
 0x387   :  { %v3041_v25 = vpack.c.bf16 %v3012_v14, %v3012_v14 }
 0x388   :  { %6427 = vmatpush3.bf16.msra.mxu1 %v7134_v0  ;;  %6441 = vmatpush3.bf16.msra.mxu0 %v7135_v35  ;;  %v7181_v35 = vld [vmem:[%s9093_s6 + $0x6c8] sm:$0xff]  }
 0x389   :  { %6428 = vmatprep.subr.bf16.mxu1 %v7136_v52  ;;  %6442 = vmatprep.subr.bf16.mxu0 %v7137_v2 }
 0x38c   :  { %6429 = vmatpush3.bf16.msra.mxu1 %v7138_v3  ;;  %6443 = vmatpush3.bf16.msra.mxu0 %v7139_v62  ;;  %v7182_v3 = vld [vmem:[%s9093_s6 + $0x688] sm:$0xff]   ;;  %v7183_v62 = vld [vmem:[%s9093_s6 + $0x6c0] sm:$0xff]  }
 0x38d   :  { %6430 = vmatprep.subr.bf16.mxu1 %v7140_v42  ;;  %6444 = vmatprep.subr.bf16.mxu0 %v7141_v10  ;;  %v7184_v42 = vld [vmem:[%s9093_s6 + $0x680] sm:$0xff]   ;;  %v3010_v10 = vmul.f32 %v8721_v8, %v8365_v16 }
 0x390   :  { %6431 = vmatpush3.bf16.msra.mxu1 %v7142_v13  ;;  %6445 = vmatpush3.bf16.msra.mxu0 %v7143_v24  ;;  %v3039_v13 = vpack.c.bf16 %v3010_v10, %v3010_v10  ;;  %v5935_v24 = vld [vmem:[%s9096_s9 + $0x2] ss:$0 sm:$0xff] }
 0x391   :  { %6446 = vmatprep.subr.bf16.mxu0 %v7144_v38  ;;  %6460 = vmatprep.subr.bf16.mxu1 %v7145_v20 }
 0x393   :  { %5283 = vmatmul.mubr.bf16.vlgmr.msra.gmra.mxu1 %v3033_v36 }
 0x394   :  { %6447 = vmatpush3.bf16.msra.mxu0 %v7146_v22  ;;  %6461 = vmatpush3.bf16.msra.mxu1 %v7147_v4 }
 0x395   :  { %5362 = vmatprep.mubr.bf16.mxu1 %v3038_v54  ;;  %6448 = vmatprep.subr.bf16.mxu0 %v7148_v26 }
 0x396   :  { %6462 = vmatprep.subr.bf16.mxu1 %v7149_v17 }
 0x398   :  { %6449 = vmatpush3.bf16.msra.mxu0 %v7150_v29  ;;  %6463 = vmatpush3.bf16.msra.mxu1 %v7151_v34 }
 0x399   :  { %6450 = vmatprep.subr.bf16.mxu0 %v7152_v28  ;;  %6464 = vmatprep.subr.bf16.mxu1 %v7153_v30 }
 0x39c   :  { %6451 = vmatpush3.bf16.msra.mxu0 %v7154_v31  ;;  %6465 = vmatpush3.bf16.msra.mxu1 %v7155_v43 }
 0x39d   :  { %6452 = vmatprep.subr.bf16.mxu0 %v7156_v63  ;;  %6466 = vmatprep.subr.bf16.mxu1 %v7157_v32 }
 0x3a0   :  { %6453 = vmatpush3.bf16.msra.mxu0 %v7158_v51  ;;  %6467 = vmatpush3.bf16.msra.mxu1 %v7159_v58 }
 0x3a1   :  { %6468 = vmatprep.subr.bf16.mxu1 %v7160_v6  ;;  %6482 = vmatprep.subr.bf16.mxu0 %v7161_v44 }
 0x3a3   :  { %5323 = vmatmul.mubr.bf16.vlgmr.msra.gmra.mxu0 %v3035_v7 }
 0x3a4   :  { %6469 = vmatpush3.bf16.msra.mxu1 %v7162_v41  ;;  %6483 = vmatpush3.bf16.msra.mxu0 %v7163_v5  ;;  %v5456_v41 = vld [vmem:[%s9094_s7 + $0x30] sm:$0xff]  ;;  %v5455_v5 = vld [vmem:[%s9094_s7 + $0x28] sm:$0xff] }
 0x3a5   :  { %5402 = vmatprep.mubr.bf16.mxu0 %v3040_v57  ;;  %6470 = vmatprep.subr.bf16.mxu1 %v7164_v12  ;;  %v5454_v12 = vld [vmem:[%s9094_s7 + $0x20] sm:$0xff]  ;;  %v5453_v57 = vld [vmem:[%s9094_s7 + $0x18] sm:$0xff] }
 0x3a6   :  { %6484 = vmatprep.subr.bf16.mxu0 %v7165_v18 }
 0x3a8   :  { %6471 = vmatpush3.bf16.msra.mxu1 %v7166_v45  ;;  %6485 = vmatpush3.bf16.msra.mxu0 %v7167_v23 }
 0x3a9   :  { %6472 = vmatprep.subr.bf16.mxu1 %v7168_v27  ;;  %6486 = vmatprep.subr.bf16.mxu0 %v7169_v46  ;;  %v5452_v27 = vld [vmem:[%s9094_s7 + $0x10] sm:$0xff] }
 0x3ac   :  { %6473 = vmatpush3.bf16.msra.mxu1 %v7170_v47  ;;  %6487 = vmatpush3.bf16.msra.mxu0 %v7171_v50  ;;  %v5451_v50 = vld [vmem:[%s9094_s7 + $0x8] sm:$0xff] }
 0x3ad   :  { %6474 = vmatprep.subr.bf16.mxu1 %v7172_v56  ;;  %6488 = vmatprep.subr.bf16.mxu0 %v7173_v39  ;;  %v5450_v56 = vld [vmem:[%s9094_s7] sm:$0xff] }
 0x3b0   :  { %6475 = vmatpush3.bf16.msra.mxu1 %v7174_v48  ;;  %6489 = vmatpush3.bf16.msra.mxu0 %v7175_v59 }
 0x3b1   :  { %6490 = vmatprep.subr.bf16.mxu0 %v7176_v11  ;;  %6580 = vmatprep.subr.bf16.mxu1 %v7215_v1 }
 0x3b3   :  { %5363 = vmatmul.mubr.bf16.vlgmr.msra.gmra.mxu1 %v3037_v60  ;;  %v6212_v37 = vpop.f32.mrf.mxu1 }
 0x3b4   :  { %6491 = vmatpush3.bf16.msra.mxu0 %v7177_v61  ;;  %6581 = vmatpush3.bf16.msra.mxu1 %v7180_v49 }
 0x3b5   :  { %v6213_v0 = vpop.f32.mrf.mxu1  ;;  %6492 = vmatprep.subr.bf16.mxu0 %v7178_v15  ;;  %6582 = vmatprep.mubr.msk.bf16.mxu1 %vm7216_vm1, %v7215_v1 }
 0x3b6   :  { %v6214_v52 = vadd.f32 %v6213_v0, %v6212_v37  ;;  %6586 = vmatprep.subr.mxu1 %v7215_v1 }
 0x3b7   :  { %v6215_v2 = vpop.f32.mrf.mxu1 }
 0x3b8   :  { %6493 = vmatpush3.bf16.msra.mxu0 %v7179_v9  ;;  %v4885_v20 = vadd.f32 %v6214_v52, %v5935_v24 }
 0x3b9   :  { %v6216_v19 = vpop.f32.mrf.mxu1  ;;  %6494 = vmatprep.subr.bf16.mxu0 %v7181_v35 }
 0x3bb   :  { %6583 = vmatmul.mubr.msk.bf16.vlgmr.msra.gmra.mxu1 %vm4846_vm6, %v3041_v25 }
 0x3bc   :  { %6495 = vmatpush3.bf16.msra.mxu0 %v7182_v3  ;;  %6602 = vmatprep.mubr.msk.f32.mxu1 %vm7216_vm1, %v7215_v1 }
 0x3bd   :  { %6496 = vmatprep.subr.bf16.mxu0 %v7183_v62  ;;  %6587 = vmatpush3.msk.msra.mxu1 %vm63_vm0, %v5457_v40 }
 0x3be   :  { %6588 = vmatprep.subr.mxu1 %v7215_v1 }
 0x3bf   :  { %6589 = vmatpush3.msra.mxu1 %v5456_v41 }
 0x3c0   :  { %6497 = vmatpush3.bf16.msra.mxu0 %v7184_v42  ;;  %6590 = vmatprep.subr.mxu1 %v7215_v1 }
 0x3c1   :  { %6605 = vmatprep.subr.mxu0 %v7215_v1  ;;  %6591 = vmatpush3.msra.mxu1 %v5455_v5 }
 0x3c2   :  { %6592 = vmatprep.subr.mxu1 %v7215_v1 }
 0x3c3   :  { %5403 = vmatmul.mubr.bf16.vlgmr.msra.gmra.mxu0 %v3039_v13  ;;  %v6234_v53 = vpop.f32.mrf.mxu0  ;;  %6593 = vmatpush3.msra.mxu1 %v5454_v12  ;;  %v5540_v12 = vld [vmem:[%s9095_s8 + $0x8] sm:$0x7f] }
 0x3c4   :  { %6609 = vmatprep.mubr.msk.f32.mxu0 %vm7216_vm1, %v7215_v1  ;;  %6594 = vmatprep.subr.mxu1 %v7215_v1 }
 0x3c5   :  { %v6235_v38 = vpop.f32.mrf.mxu0  ;;  %6595 = vmatpush3.msra.mxu1 %v5453_v57  ;;  %6606 = vmatpush3.msk.msra.mxu0 %vm5549_vm7, %v5540_v12  ;;  %v6162_v57 = vld [vmem:[%s9096_s9 + $0x3] ss:$0 sm:$0xff] }
 0x3c6   :  { %v6236_v21 = vadd.f32 %v6235_v38, %v6234_v53  ;;  %6596 = vmatprep.subr.mxu1 %v7215_v1  ;;  %6607 = vmatprep.subr.mxu0 %v7215_v1 }
 0x3c7   :  { %v6237_v22 = vpop.f32.mrf.mxu0  ;;  %6597 = vmatpush3.msra.mxu1 %v5452_v27 }
 0x3c8   :  { %v4925_v4 = vadd.f32 %v6236_v21, %v4885_v20  ;;  %6598 = vmatprep.subr.mxu1 %v7215_v1 }
 0x3c9   :  { %v6238_v16 = vpop.f32.mrf.mxu0  ;;  %6599 = vmatpush3.msra.mxu1 %v5451_v50 }
 0x3ca   :  { %6600 = vmatprep.subr.mxu1 %v7215_v1 }
 0x3cb   :  { %6601 = vmatpush3.msra.mxu1 %v5450_v56 }
 0x3d3   :  { %v6256_v8 = vpop.f32.mrf.mxu1 }
 0x3d5   :  { %v6257_v36 = vpop.f32.mrf.mxu1 }
 0x3d6   :  { %v6258_v26 = vadd.f32 %v6257_v36, %v6256_v8 }
 0x3d7   :  { %v6259_v17 = vpop.f32.mrf.mxu1 }
 0x3d8   :  { %v4965_v54 = vadd.f32 %v6258_v26, %v4925_v4 }
 0x3d9   :  { %v6260_v29 = vpop.f32.mrf.mxu1 }
 0x3e3   :  { %v6278_v34 = vpop.f32.mrf.mxu0 }
 0x3e5   :  { %v6279_v28 = vpop.f32.mrf.mxu0 }
 0x3e6   :  { %v6280_v30 = vadd.f32 %v6279_v28, %v6278_v34 }
 0x3e7   :  { %v6281_v31 = vpop.f32.mrf.mxu0 }
 0x3e8   :  { %v5005_v43 = vadd.f32 %v6280_v30, %v4965_v54 }
 0x3e9   :  { %v6282_v63 = vpop.f32.mrf.mxu0 }
 0x3f3   :  { %v6300_v32 = vpop.f32.mrf.mxu1 }
 0x3f5   :  { %v6301_v51 = vpop.f32.mrf.mxu1 }
 0x3f6   :  { %v6302_v58 = vadd.f32 %v6301_v51, %v6300_v32 }
 0x3f7   :  { %v6303_v33 = vpop.f32.mrf.mxu1 }
 0x3f8   :  { %v5045_v6 = vadd.f32 %v6302_v58, %v5005_v43 }
 0x3f9   :  { %v6304_v44 = vpop.f32.mrf.mxu1 }
 0x403   :  { %v6322_v7 = vpop.f32.mrf.mxu0 }
 0x405   :  { %v6323_v18 = vpop.f32.mrf.mxu0 }
 0x406   :  { %v6324_v45 = vadd.f32 %v6323_v18, %v6322_v7  ;;  %v5539_v18 = vld [vmem:[%s9095_s8] sm:$0xff]  ;;  %s7218_s8 = smov [#allocation2]  }
 0x407   :  { %v6325_v23 = vpop.f32.mrf.mxu0  ;;  %6608 = vmatpush3.msra.mxu0 %v5539_v18  ;;  %s5632_s23 = sshll.u32 %s7218_s8, 4  ;;  %s5633_s23 = int_to_ptr.vmem [resolvable:$true] %s5632_s23 }
 0x408   :  { %v5085_v46 = vadd.f32 %v6324_v45, %v5045_v6  ;;  %s7193_s24 = scalar_lea.vmem %s5633_s23, 128  ;;  %p7198_p1 = scmp.lt.s32.totalorder %s5633_s23, %s5633_s23 }
 0x409   :  { %v6326_v47 = vpop.f32.mrf.mxu0  ;;  %p7194_p0 = scmp.ne.s32.totalorder %s5633_s23, %s7193_s24  ;;  %p7199_p2 = scmp.lt.s32.totalorder %s7193_s24, %s7193_s24 }
 0x40a   :  { %v6165_v47 = vld [vmem:[%s9096_s9 + $0x4] ss:$0 sm:$0xff] }
 0x40b   :  { %p7200_p3 = por %p7199_p2, %p7198_p1 }
 0x40d   :  { %p7201_p4 = pnand %p7200_p3, %p7194_p0 }
 0x413   :  { %v6344_v39 = vpop.f32.mrf.mxu1 }
 0x415   :  { %v6345_v48 = vpop.f32.mrf.mxu1 }
 0x416   :  { %v6346_v59 = vadd.f32 %v6345_v48, %v6344_v39 }
 0x417   :  { %v6347_v55 = vpop.f32.mrf.mxu1 }
 0x418   :  { %v5125_v11 = vadd.f32 %v6346_v59, %v5085_v46 }
 0x419   :  { %v6348_v61 = vpop.f32.mrf.mxu1 }
 0x423   :  { %v6366_v49 = vpop.f32.mrf.mxu0 }
 0x425   :  { %v6367_v60 = vpop.f32.mrf.mxu0 }
 0x426   :  { %v6368_v15 = vadd.f32 %v6367_v60, %v6366_v49 }
 0x427   :  { %v6369_v37 = vpop.f32.mrf.mxu0 }
 0x428   :  { %v5165_v9 = vadd.f32 %v6368_v15, %v5125_v11 }
 0x429   :  { %v6370_v14 = vpop.f32.mrf.mxu0 }
 0x433   :  { %v6388_v0 = vpop.f32.mrf.mxu1 }
 0x435   :  { %v6389_v35 = vpop.f32.mrf.mxu1 }
 0x436   :  { %v6390_v52 = vadd.f32 %v6389_v35, %v6388_v0 }
 0x437   :  { %v6391_v2 = vpop.f32.mrf.mxu1 }
 0x438   :  { %v5205_v3 = vadd.f32 %v6390_v52, %v5165_v9 }
 0x439   :  { %v6392_v25 = vpop.f32.mrf.mxu1 }
 0x443   :  { %v6410_v19 = vpop.f32.mrf.mxu0 }
 0x445   :  { %v6411_v62 = vpop.f32.mrf.mxu0 }
 0x446   :  { %v6412_v54 = vadd.f32 %v6411_v62, %v6410_v19 }
 0x447   :  { %v6413_v42 = vpop.f32.mrf.mxu0 }
 0x448   :  { %v5245_v30 = vadd.f32 %v6412_v54, %v5205_v3 }
 0x449   :  { %v6414_v10 = vpop.f32.mrf.mxu0 }
 0x453   :  { %v6432_v13 = vpop.f32.mrf.mxu1 }
 0x455   :  { %v6433_v24 = vpop.f32.mrf.mxu1 }
 0x456   :  { %v6434_v34 = vadd.f32 %v6433_v24, %v6432_v13 }
 0x457   :  { %v6435_v53 = vpop.f32.mrf.mxu1 }
 0x458   :  { %v5285_v63 = vadd.f32 %v6434_v34, %v5245_v30 }
 0x459   :  { %v6436_v38 = vpop.f32.mrf.mxu1 }
 0x463   :  { %v6454_v20 = vpop.f32.mrf.mxu0 }
 0x465   :  { %v6455_v21 = vpop.f32.mrf.mxu0 }
 0x466   :  { %v6456_v31 = vadd.f32 %v6455_v21, %v6454_v20 }
 0x467   :  { %v6457_v22 = vpop.f32.mrf.mxu0 }
 0x468   :  { %v5325_v58 = vadd.f32 %v6456_v31, %v5285_v63 }
 0x469   :  { %v6458_v4 = vpop.f32.mrf.mxu0 }
 0x473   :  { %v6476_v16 = vpop.f32.mrf.mxu1 }
 0x475   :  { %v6477_v8 = vpop.f32.mrf.mxu1 }
 0x476   :  { %v6478_v32 = vadd.f32 %v6477_v8, %v6476_v16 }
 0x477   :  { %v6479_v36 = vpop.f32.mrf.mxu1 }
 0x478   :  { %v5365_v6 = vadd.f32 %v6478_v32, %v5325_v58 }
 0x479   :  { %v6480_v26 = vpop.f32.mrf.mxu1 }
 0x47b   :  { %v5444_v17 = vpop.f32.mrf.mxu1 }
 0x47d   :  { %v6584_v29 = vpop.f32.mrf.mxu1 }
 0x47f   :  { %v5447_v28 = vpop.f32.mrf.mxu1 }
 0x481   :  { %v6585_v43 = vpop.f32.mrf.mxu1 }
 0x483   :  { %v6498_v51 = vpop.f32.mrf.mxu0 }
 0x485   :  { %v6499_v33 = vpop.f32.mrf.mxu0 }
 0x486   :  { %v6500_v44 = vadd.f32 %v6499_v33, %v6498_v51 }
 0x487   :  { %v6501_v40 = vpop.f32.mrf.mxu0 }
 0x488   :  { %v5405_v41 = vadd.f32 %v6500_v44, %v5365_v6 }
 0x489   :  { %v6502_v5 = vpop.f32.mrf.mxu0 }
 0x48a   :  { %v5445_v7 = vadd.f32 %v5444_v17, %v5405_v41 }
 0x48c   :  { %6603 = vmatmul.mubr.msk.f32.vlgmr.msra.gmra.mxu1 %vm898_vm5, %v5445_v7 }
 0x54c   :  { %v5534_v45 = vpop.f32.mrf.mxu1 }
 0x54d   :  { %v5535_v23 = vadd.f32 %v6162_v57, %v5534_v45 }
 0x54e   :  { %v6604_v27 = vpop.f32.mrf.mxu1 }
 0x54f   :  { %7189 = vtanh.f32 %v5535_v23 }
 0x55c   :  { %v7190_v46 = vpop.eup %7189 }
 0x55d   :  { %6610 = vmatmul.mubr.msk.f32.vlgmr.msra.gmra.mxu0 %vm5545_vm8, %v7190_v46 }
 0x61d   :  { %v5619_v50 = vpop.f32.mrf.mxu0 }
 0x61e   :  { %v5620_v56 = vadd.f32 %v6165_v47, %v5619_v50 }
 0x61f   :  { %v6611_v39 = vpop.f32.mrf.mxu0 }
 0x620   :  { %7191 = vtanh.f32 %v5620_v56 }
 0x62d   :  { %v7192_v1 = vpop.eup %7191 }
 0x62e   :  { %5625 = vst.msk [vmem:[#allocation2] sm:$0xff] %vm5624_vm9, %v7192_v1 }
 0x62f   :  { %7204 = shalt.err (!%p7201_p4)
}
 0x630   :  { %5635 = dma.vmem_to_hbm [thread:$0]  %s5633_s23, 128, %s9097_s10, [#allocation3]  }
 0x631   :  { %7213 = dma.done.wait [#allocation3], 128  }
 0x632   :  { %7214 = vsyncadd [#allocation3], 4294967168 }
 0x633   :  { %5639 = vsyncpa [#allocation3], 1 }

</bundles_post_ra>
